<compile_context>
chip_gen: v5e
topology: v5e:2x2
jax: 0.10.0
libtpu: 0.0.40
codegen_flags: <defaults>
</compile_context>

<pallas_src>
import functools

import jax
import jax.numpy as jnp
from jax.experimental import pallas as pl
from jax.experimental.pallas import tpu as pltpu

TAP = 8  # sublane-padded rows per conv tap (Cout=3 -> padded to 8)


def _convt_silu_kernel(wp_ref, xp_ref, b_ref, o_ref, m_ref, *, K, Wp, R_pad):
    # wp_ref: (K*K*TAP, Cin)   bf16  flipped weight, tap-major, Cout padded to TAP
    # xp_ref: (Cin, xcols)     bf16  zero-padded input, flattened over (Hp, Wp)
    # b_ref : (TAP, 1)         f32   bias (zero-padded rows)
    # o_ref : (TAP, R_pad)     f32   output; rows >= Cout / lanes >= R are scratch
    # m_ref : (K*K*TAP, xcols) f32   scratch holding the packed matmul result
    m_ref[...] = jnp.dot(wp_ref[...], xp_ref[...],
                         preferred_element_type=jnp.float32)
    # Tap t=0 (offset 0) initialises the accumulator; bias folded into the init.
    acc = m_ref[0:TAP, 0:R_pad] + b_ref[...]
    for t in range(1, K * K):                         # statically unrolled
        kh, kw = divmod(t, K)
        off = kh * Wp + kw                            # flat lane shift of tap t
        acc = acc + m_ref[t * TAP:(t + 1) * TAP, off:off + R_pad]
    o_ref[...] = acc * jax.nn.sigmoid(acc)            # SiLU in f32, one store


def convt_silu_pallas(x_nchw, w, b):
    """x_nchw: (1, Cin, H, W); w: (Cin, Cout, K, K) torch layout; b: (Cout,)."""
    N, Cin, H, W = x_nchw.shape
    assert N == 1
    Cin_w, Cout, K, K2 = w.shape
    assert Cin_w == Cin and K == K2 and Cout <= TAP
    P = K - 1
    Ho, Wo = H + P, W + P
    Hp, Wp = H + 2 * P, W + 2 * P
    R = Ho * Wp                                   # flat output extent (incl. q>=Wo)
    R_pad = -(-R // 128) * 128                    # lane-dense output width
    max_off = P * Wp + P
    xcols = -(-max(Hp * Wp, max_off + R_pad) // 128) * 128  # zero-padded input cols
    rows = K * K * TAP

    # --- wrapper glue (tiny XLA ops; no input/output transposes) ---
    x_flat = x_nchw.reshape(Cin, H, W)                              # free reshape
    xp = jnp.pad(x_flat, ((0, 0), (P, P), (P, P)))                  # (Cin, Hp, Wp)
    xp = jnp.pad(xp.reshape(Cin, Hp * Wp),
                 ((0, 0), (0, xcols - Hp * Wp))).astype(jnp.bfloat16)

    wflip = w[:, :, ::-1, ::-1]                                     # spatial flip
    wp = jnp.transpose(wflip, (2, 3, 1, 0)).reshape(K * K, Cout, Cin)
    wp = jnp.pad(wp, ((0, 0), (0, TAP - Cout), (0, 0)))             # taps -> 8 rows
    wp = wp.reshape(rows, Cin).astype(jnp.bfloat16)                 # (200, Cin)

    b_pad = jnp.pad(b.astype(jnp.float32), (0, TAP - Cout)).reshape(TAP, 1)

    kernel = functools.partial(_convt_silu_kernel, K=K, Wp=Wp, R_pad=R_pad)

    cost = pl.CostEstimate(
        flops=2 * rows * Cin * xcols,
        transcendentals=TAP * R_pad,
        bytes_accessed=Cin * xcols * 2 + rows * Cin * 2 + TAP * R_pad * 4)

    out_flat = pl.pallas_call(
        kernel,
        out_shape=jax.ShapeDtypeStruct((TAP, R_pad), jnp.float32),
        grid=(1,),                                                   # single step
        in_specs=[
            pl.BlockSpec((rows, Cin), lambda i: (0, 0)),
            pl.BlockSpec((Cin, xcols), lambda i: (0, 0)),
            pl.BlockSpec((TAP, 1), lambda i: (0, 0)),
        ],
        out_specs=pl.BlockSpec((TAP, R_pad), lambda i: (0, 0)),
        scratch_shapes=[pltpu.VMEM((rows, xcols), jnp.float32)],
        compiler_params=pltpu.CompilerParams(
            dimension_semantics=("arbitrary",)),
        cost_estimate=cost,
    )(wp, xp, b_pad)

    # Un-pad: (TAP, R_pad) -> (Cout, Ho, Wo). Already NCHW order, no transpose.
    out = out_flat[:Cout, :R].reshape(Cout, Ho, Wp)[:, :, :Wo]
    return out[None]                                                 # (1,Cout,Ho,Wo)


def ref_convt_silu(x_nchw, w, b):
    """Pure-JAX f32 reference using the scatter formulation of conv_transpose."""
    N, Cin, H, W = x_nchw.shape
    _, Cout, K, _ = w.shape
    Ho, Wo = H + K - 1, W + K - 1
    y = jnp.zeros((N, Cout, Ho, Wo), jnp.float32)
    for kh in range(K):
        for kw in range(K):
            contrib = jnp.einsum('nchw,cd->ndhw', x_nchw, w[:, :, kh, kw])
            y = y.at[:, :, kh:kh + H, kw:kw + W].add(contrib)
    y = y + b[None, :, None, None]
    return y * jax.nn.sigmoid(y)


if __name__ == "__main__":
    key = jax.random.PRNGKey(0)
    kx, kw_, kb = jax.random.split(key, 3)

    # Module requires Cin=167, Cout=3, K=5; small spatial dims (16x16).
    Cin, Cout, K = 167, 3, 5
    H = W_sp = 16
    x1 = jax.random.normal(kx, (1, Cin, H, W_sp), jnp.float32)
    weight = 0.05 * jax.random.normal(kw_, (Cin, Cout, K, K), jnp.float32)
    bias = 0.1 * jax.random.normal(kb, (Cout,), jnp.float32)

    out = jax.block_until_ready(convt_silu_pallas(x1, weight, bias))
    ref = jax.block_until_ready(ref_convt_silu(x1, weight, bias))

    assert out.shape == (1, Cout, H + K - 1, W_sp + K - 1), out.shape
    # bf16 input rounding over a 167*25-term reduction gives ~1e-2 worst-case
    # absolute error on the pre-activation; tolerance sized accordingly.
    assert jnp.allclose(out, ref, rtol=2e-2, atol=3e-2), float(
        jnp.max(jnp.abs(out - ref)))

    print("KERNEL_OK")
</pallas_src>

<mosaic_0001>
module attributes {stable_mosaic.version = 11 : i64} {
  func.func @_convt_silu_kernel(%arg0: i32, %arg1: memref<200x167xbf16, #tpu.memory_space<vmem>>, %arg2: memref<167x640xbf16, #tpu.memory_space<vmem>>, %arg3: memref<8x1xf32, #tpu.memory_space<vmem>>, %arg4: memref<8x512xf32, #tpu.memory_space<vmem>>, %arg5: memref<200x640xf32, #tpu.memory_space<vmem>>) attributes {dimension_semantics = [#tpu.dimension_semantics<arbitrary>], iteration_bounds = array<i64: 1>, scalar_prefetch = 0 : i64, scratch_operands = 1 : i64, tpu.core_type = #tpu.core_type<tc>, window_params = [{pipeline_mode = #tpu.pipeline_mode<synchronous>, transform_indices = @transform_0, window_bounds = array<i64: 200, 167>}, {pipeline_mode = #tpu.pipeline_mode<synchronous>, transform_indices = @transform_1, window_bounds = array<i64: 167, 640>}, {pipeline_mode = #tpu.pipeline_mode<synchronous>, transform_indices = @transform_2, window_bounds = array<i64: 8, 1>}, {pipeline_mode = #tpu.pipeline_mode<synchronous>, transform_indices = @transform_3, window_bounds = array<i64: 8, 512>}]} {
    %c0 = arith.constant 0 : index
    %c0_0 = arith.constant 0 : index
    %0 = vector.load %arg1[%c0, %c0_0] : memref<200x167xbf16, #tpu.memory_space<vmem>>, vector<200x167xbf16>
    %c0_1 = arith.constant 0 : index
    %c0_2 = arith.constant 0 : index
    %1 = vector.load %arg2[%c0_1, %c0_2] : memref<167x640xbf16, #tpu.memory_space<vmem>>, vector<167x640xbf16>
    %cst = arith.constant dense<0.000000e+00> : vector<200x640xf32>
    %2 = tpu.matmul %0, %1, %cst {dimension_numbers = #tpu.dot_dimension_numbers<[1], [0], [0], [1], [0, 0, 1, 1], [], []>} : vector<200x167xbf16>, vector<167x640xbf16>, vector<200x640xf32> -> vector<200x640xf32>
    %c0_3 = arith.constant 0 : index
    %c0_4 = arith.constant 0 : index
    %3 = vector.load %arg5[%c0_3, %c0_4] : memref<200x640xf32, #tpu.memory_space<vmem>>, vector<200x640xf32>
    tpu.vector_store %arg5[%c0_3, %c0_4], %2 {strides = array<i32>} : memref<200x640xf32, #tpu.memory_space<vmem>>, vector<200x640xf32>,
    %c0_5 = arith.constant 0 : index
    %c0_6 = arith.constant 0 : index
    %4 = vector.load %arg5[%c0_5, %c0_6] : memref<200x640xf32, #tpu.memory_space<vmem>>, vector<8x512xf32>
    %c0_7 = arith.constant 0 : index
    %c0_8 = arith.constant 0 : index
    %5 = vector.load %arg3[%c0_7, %c0_8] : memref<8x1xf32, #tpu.memory_space<vmem>>, vector<8x1xf32>
    %6 = vector.broadcast %5 : vector<8x1xf32> to vector<8x512xf32>
    %7 = arith.addf %4, %6 : vector<8x512xf32>
    %c8 = arith.constant 8 : index
    %c1 = arith.constant 1 : index
    %8 = vector.load %arg5[%c8, %c1] : memref<200x640xf32, #tpu.memory_space<vmem>>, vector<8x512xf32>
    %9 = arith.addf %7, %8 : vector<8x512xf32>
    %c16 = arith.constant 16 : index
    %c2 = arith.constant 2 : index
    %10 = vector.load %arg5[%c16, %c2] : memref<200x640xf32, #tpu.memory_space<vmem>>, vector<8x512xf32>
    %11 = arith.addf %9, %10 : vector<8x512xf32>
    %c24 = arith.constant 24 : index
    %c3 = arith.constant 3 : index
    %12 = vector.load %arg5[%c24, %c3] : memref<200x640xf32, #tpu.memory_space<vmem>>, vector<8x512xf32>
    %13 = arith.addf %11, %12 : vector<8x512xf32>
    %c32 = arith.constant 32 : index
    %c4 = arith.constant 4 : index
    %14 = vector.load %arg5[%c32, %c4] : memref<200x640xf32, #tpu.memory_space<vmem>>, vector<8x512xf32>
    %15 = arith.addf %13, %14 : vector<8x512xf32>
    %c40 = arith.constant 40 : index
    %c24_9 = arith.constant 24 : index
    %16 = vector.load %arg5[%c40, %c24_9] : memref<200x640xf32, #tpu.memory_space<vmem>>, vector<8x512xf32>
    %17 = arith.addf %15, %16 : vector<8x512xf32>
    %c48 = arith.constant 48 : index
    %c25 = arith.constant 25 : index
    %18 = vector.load %arg5[%c48, %c25] : memref<200x640xf32, #tpu.memory_space<vmem>>, vector<8x512xf32>
    %19 = arith.addf %17, %18 : vector<8x512xf32>
    %c56 = arith.constant 56 : index
    %c26 = arith.constant 26 : index
    %20 = vector.load %arg5[%c56, %c26] : memref<200x640xf32, #tpu.memory_space<vmem>>, vector<8x512xf32>
    %21 = arith.addf %19, %20 : vector<8x512xf32>
    %c64 = arith.constant 64 : index
    %c27 = arith.constant 27 : index
    %22 = vector.load %arg5[%c64, %c27] : memref<200x640xf32, #tpu.memory_space<vmem>>, vector<8x512xf32>
    %23 = arith.addf %21, %22 : vector<8x512xf32>
    %c72 = arith.constant 72 : index
    %c28 = arith.constant 28 : index
    %24 = vector.load %arg5[%c72, %c28] : memref<200x640xf32, #tpu.memory_space<vmem>>, vector<8x512xf32>
    %25 = arith.addf %23, %24 : vector<8x512xf32>
    %c80 = arith.constant 80 : index
    %c48_10 = arith.constant 48 : index
    %26 = vector.load %arg5[%c80, %c48_10] : memref<200x640xf32, #tpu.memory_space<vmem>>, vector<8x512xf32>
    %27 = arith.addf %25, %26 : vector<8x512xf32>
    %c88 = arith.constant 88 : index
    %c49 = arith.constant 49 : index
    %28 = vector.load %arg5[%c88, %c49] : memref<200x640xf32, #tpu.memory_space<vmem>>, vector<8x512xf32>
    %29 = arith.addf %27, %28 : vector<8x512xf32>
    %c96 = arith.constant 96 : index
    %c50 = arith.constant 50 : index
    %30 = vector.load %arg5[%c96, %c50] : memref<200x640xf32, #tpu.memory_space<vmem>>, vector<8x512xf32>
    %31 = arith.addf %29, %30 : vector<8x512xf32>
    %c104 = arith.constant 104 : index
    %c51 = arith.constant 51 : index
    %32 = vector.load %arg5[%c104, %c51] : memref<200x640xf32, #tpu.memory_space<vmem>>, vector<8x512xf32>
    %33 = arith.addf %31, %32 : vector<8x512xf32>
    %c112 = arith.constant 112 : index
    %c52 = arith.constant 52 : index
    %34 = vector.load %arg5[%c112, %c52] : memref<200x640xf32, #tpu.memory_space<vmem>>, vector<8x512xf32>
    %35 = arith.addf %33, %34 : vector<8x512xf32>
    %c120 = arith.constant 120 : index
    %c72_11 = arith.constant 72 : index
    %36 = vector.load %arg5[%c120, %c72_11] : memref<200x640xf32, #tpu.memory_space<vmem>>, vector<8x512xf32>
    %37 = arith.addf %35, %36 : vector<8x512xf32>
    %c128 = arith.constant 128 : index
    %c73 = arith.constant 73 : index
    %38 = vector.load %arg5[%c128, %c73] : memref<200x640xf32, #tpu.memory_space<vmem>>, vector<8x512xf32>
    %39 = arith.addf %37, %38 : vector<8x512xf32>
    %c136 = arith.constant 136 : index
    %c74 = arith.constant 74 : index
    %40 = vector.load %arg5[%c136, %c74] : memref<200x640xf32, #tpu.memory_space<vmem>>, vector<8x512xf32>
    %41 = arith.addf %39, %40 : vector<8x512xf32>
    %c144 = arith.constant 144 : index
    %c75 = arith.constant 75 : index
    %42 = vector.load %arg5[%c144, %c75] : memref<200x640xf32, #tpu.memory_space<vmem>>, vector<8x512xf32>
    %43 = arith.addf %41, %42 : vector<8x512xf32>
    %c152 = arith.constant 152 : index
    %c76 = arith.constant 76 : index
    %44 = vector.load %arg5[%c152, %c76] : memref<200x640xf32, #tpu.memory_space<vmem>>, vector<8x512xf32>
    %45 = arith.addf %43, %44 : vector<8x512xf32>
    %c160 = arith.constant 160 : index
    %c96_12 = arith.constant 96 : index
    %46 = vector.load %arg5[%c160, %c96_12] : memref<200x640xf32, #tpu.memory_space<vmem>>, vector<8x512xf32>
    %47 = arith.addf %45, %46 : vector<8x512xf32>
    %c168 = arith.constant 168 : index
    %c97 = arith.constant 97 : index
    %48 = vector.load %arg5[%c168, %c97] : memref<200x640xf32, #tpu.memory_space<vmem>>, vector<8x512xf32>
    %49 = arith.addf %47, %48 : vector<8x512xf32>
    %c176 = arith.constant 176 : index
    %c98 = arith.constant 98 : index
    %50 = vector.load %arg5[%c176, %c98] : memref<200x640xf32, #tpu.memory_space<vmem>>, vector<8x512xf32>
    %51 = arith.addf %49, %50 : vector<8x512xf32>
    %c184 = arith.constant 184 : index
    %c99 = arith.constant 99 : index
    %52 = vector.load %arg5[%c184, %c99] : memref<200x640xf32, #tpu.memory_space<vmem>>, vector<8x512xf32>
    %53 = arith.addf %51, %52 : vector<8x512xf32>
    %c192 = arith.constant 192 : index
    %c100 = arith.constant 100 : index
    %54 = vector.load %arg5[%c192, %c100] : memref<200x640xf32, #tpu.memory_space<vmem>>, vector<8x512xf32>
    %55 = arith.addf %53, %54 : vector<8x512xf32>
    %56 = arith.negf %55 : vector<8x512xf32>
    %57 = math.exp %56 : vector<8x512xf32>
    %cst_13 = arith.constant 1.000000e+00 : f32
    %58 = vector.broadcast %cst_13 : f32 to vector<8x512xf32>
    %59 = arith.addf %58, %57 : vector<8x512xf32>
    %60 = arith.divf %58, %59 : vector<8x512xf32>
    %61 = arith.mulf %55, %60 : vector<8x512xf32>
    %c0_14 = arith.constant 0 : index
    %c0_15 = arith.constant 0 : index
    %62 = vector.load %arg4[%c0_14, %c0_15] : memref<8x512xf32, #tpu.memory_space<vmem>>, vector<8x512xf32>
    tpu.vector_store %arg4[%c0_14, %c0_15], %61 {strides = array<i32>} : memref<8x512xf32, #tpu.memory_space<vmem>>, vector<8x512xf32>,
    return
  }
  func.func @transform_0(%arg0: i32) -> (i32, i32) {
    %c0_i32 = arith.constant 0 : i32
    %c0_i32_0 = arith.constant 0 : i32
    %c0_i32_1 = arith.constant 0 : i32
    return %c0_i32, %c0_i32_0 : i32, i32
  }
  func.func @transform_1(%arg0: i32) -> (i32, i32) {
    %c0_i32 = arith.constant 0 : i32
    %c0_i32_0 = arith.constant 0 : i32
    %c0_i32_1 = arith.constant 0 : i32
    return %c0_i32, %c0_i32_0 : i32, i32
  }
  func.func @transform_2(%arg0: i32) -> (i32, i32) {
    %c0_i32 = arith.constant 0 : i32
    %c0_i32_0 = arith.constant 0 : i32
    %c0_i32_1 = arith.constant 0 : i32
    return %c0_i32, %c0_i32_0 : i32, i32
  }
  func.func @transform_3(%arg0: i32) -> (i32, i32) {
    %c0_i32 = arith.constant 0 : i32
    %c0_i32_0 = arith.constant 0 : i32
    %c0_i32_1 = arith.constant 0 : i32
    return %c0_i32, %c0_i32_0 : i32, i32
  }
}

</mosaic_0001>

<bundles_post_ra>
// kernel: tpu_custom_call.1
= control target key start
LH: loop header
LB: loop body
LE: loop exit
PB: predicated region body
PF: predicated region fallthrough
CT: control target
= control target key end

     0   :  { %8 = vsyncpa [#allocation4], 0  ;;  %s4049_s0 = inlined_call_operand.vmem [shape: bf16[200,167], index: 0, kind: input, shape index: {}]   ;;  %s4050_s1 = inlined_call_operand.hbm [shape: bf16[167,640], index: 1, kind: input, shape index: {}]   ;;  %s4051_s2 = inlined_call_operand.vmem [shape: f32[8,1], index: 2, kind: input, shape index: {}]   ;;  %s4052_s3 = inlined_call_operand.hbm [shape: f32[8,512], index: 3, kind: output, shape index: {}]  }
   0x1   :  { %9 = vsyncpa [#allocation5], 0  ;;  %s16_s14 = sshll.u32 %s4050_s1, 4  ;;  %s2872_s15 = smov [#allocation3]   ;;  %s17_s14 = int_to_ptr.hbm [resolvable:$true] %s16_s14 }
   0x2   :  { %s18_s16 = sshll.u32 %s2872_s15, 4  ;;  %s2873_s17 = smov 320   ;;  %s19_s16 = int_to_ptr.vmem [resolvable:$true] %s18_s16 }
   0x3   :  { %s2874_s18 = smov 20  }
   0x4   :  { %24 = dma.hbm_to_vmem [thread:$0]  %s17_s14, 6720, %s19_s16, [#allocation4], %s2873_s17, %s2873_s17, %s2874_s18  }
   0x5   :  { %2868 = dma.done.wait [#allocation4], 6720  }
   0x6   :  { %2869 = vsyncadd [#allocation4], 4294960576  ;;  %vm547_vm0 = vcmask 1042432   ;;  %vm548_vm1 = vcmask 1043456   ;;  %v2875_v0 = vmov 65535   ;;  %v117_v10 = vld [vmem:[#allocation3 + $0x190] sm:$0xff] }
   0x7   :  { %v549_v1 = vsel %vm547_vm0, 4294967295, %v2875_v0  ;;  %v2566_v2 = vld [vmem:[#allocation3 + $0x118] sm:$0xf]  ;;  %v2754_v3 = vld [vmem:[#allocation3 + $0x128] sm:$0xf0]  ;;  %v397_v14 = vunpack.c.l.b16 %v117_v10  ;;  %v398_v15 = vunpack.c.h.b16 %v117_v10  ;;  %vm507_vm2 = vcmask 318464  }
   0x8   :  { %v2752_v4 = vld [vmem:[#allocation3 + $0x11c] sm:$0xf]  ;;  %v2567_v5 = vor.u32 %v2754_v3, %v2566_v2  ;;  %v2568_v6 = vld [vmem:[#allocation3 + $0x12c] sm:$0xf0]  ;;  %v2749_v8 = vld [vmem:[#allocation3 + $0x100] sm:$0xf0] }
   0x9   :  { %v2546_v7 = vld [vmem:[#allocation3 + $0xf0] sm:$0xf]  ;;  %v2571_v9 = vor.u32 %v2752_v4, %v2568_v6  ;;  %v2747_v11 = vld [vmem:[#allocation3 + $0xf4] sm:$0xf]  ;;  %v2548_v12 = vld [vmem:[#allocation3 + $0x104] sm:$0xf0]  ;;  %v452_v20 = vpack.c.b16 %v397_v14, %v397_v14  ;;  %v453_v21 = vpack.c.b16 %v398_v15, %v398_v15 }
   0xa   :  { %566 = vmatpush.bf16.msra.mxu0 %v2567_v5  ;;  %v2547_v13 = vor.u32 %v2749_v8, %v2546_v7  ;;  %v2926_v16 = vsel %vm548_vm1, %v549_v1, 0  ;;  %v2551_v17 = vor.u32 %v2747_v11, %v2548_v12  ;;  %v2526_v18 = vld [vmem:[#allocation3 + $0xc8] sm:$0xf]  ;;  %v2744_v19 = vld [vmem:[#allocation3 + $0xd8] sm:$0xf0]  ;;  %s2878_s5 = smov 79  }
   0xb   :  { %712 = vmatpush.bf16.msra.mxu2 %v2571_v9  ;;  %v2606_v22 = vld [vmem:[#allocation3 + $0x168] sm:$0xf]  ;;  %v2742_v23 = vld [vmem:[#allocation3 + $0xcc] sm:$0xf]  ;;  %v2528_v24 = vld [vmem:[#allocation3 + $0xdc] sm:$0xf0]  ;;  %v2929_v28 = vand.u32 %v2926_v16, %v452_v20  ;;  %v2932_v29 = vand.u32 %v2926_v16, %v453_v21  ;;  %v2527_v30 = vor.u32 %v2744_v19, %v2526_v18 }
   0xc   :  { %v2764_v25 = vld [vmem:[#allocation3 + $0x178] sm:$0xf0]  ;;  %v2762_v26 = vld [vmem:[#allocation3 + $0x16c] sm:$0xf]  ;;  %v2608_v27 = vld [vmem:[#allocation3 + $0x17c] sm:$0xf0]  ;;  %v2531_v31 = vor.u32 %v2742_v23, %v2528_v24 }
   0xd   :  { %v2506_v32 = vld [vmem:[#allocation3 + $0xa0] sm:$0xf]  ;;  %v2739_v33 = vld [vmem:[#allocation3 + $0xb0] sm:$0xf0]  ;;  %2767 = vmatpush.bf16.msra.mxu1 %v2929_v28  ;;  %2770 = vmatpush.bf16.msra.mxu3 %v2932_v29  ;;  %v2936_v35 = vor.u32 %v2764_v25, %v2606_v22  ;;  %v2938_v36 = vor.u32 %v2762_v26, %v2608_v27  ;;  %v2737_v37 = vld [vmem:[#allocation3 + $0xa4] sm:$0xf] }
   0xe   :  { %567 = vmatpush.bf16.msra.mxu0 %v2547_v13  ;;  %v2586_v34 = vld [vmem:[#allocation3 + $0x140] sm:$0xf]  ;;  %v2508_v38 = vld [vmem:[#allocation3 + $0xb4] sm:$0xf0]  ;;  %v2759_v40 = vld [vmem:[#allocation3 + $0x150] sm:$0xf0]  ;;  %v2507_v44 = vor.u32 %v2739_v33, %v2506_v32 }
   0xf   :  { %713 = vmatpush.bf16.msra.mxu2 %v2551_v17  ;;  %v2940_v39 = vld [vmem:[#allocation3 + $0x198] sm:$0xff]  ;;  %v2757_v41 = vld [vmem:[#allocation3 + $0x144] sm:$0xf]  ;;  %v2511_v46 = vor.u32 %v2737_v37, %v2508_v38  ;;  %v2734_v48 = vld [vmem:[#allocation3 + $0x88] sm:$0xf0]  ;;  %v2945_v51 = vor.u32 %v2759_v40, %v2586_v34  ;;  %s2879_s6 = smov 78  }
  0x10   :  { %v2588_v42 = vld [vmem:[#allocation3 + $0x154] sm:$0xf0]  ;;  %v399_v43 = vunpack.c.l.b16 %v2940_v39  ;;  %v2574_v49 = vld [vmem:[#allocation3 + $0x120] sm:$0xf]  ;;  %v2755_v50 = vld [vmem:[#allocation3 + $0x130] sm:$0xf0] }
  0x11   :  { %v2486_v45 = vld [vmem:[#allocation3 + $0x78] sm:$0xf]  ;;  %2768 = vmatpush.bf16.msra.mxu1 %v2936_v35  ;;  %2771 = vmatpush.bf16.msra.mxu3 %v2938_v36  ;;  %v2947_v52 = vor.u32 %v2757_v41, %v2588_v42  ;;  %v2703_v53 = vld [vmem:[%s4049_s0 + $0x54] sm:$0xf]  ;;  %v2372_v54 = vld [vmem:[%s4049_s0 + $0x58] sm:$0xf0]  ;;  %v2575_v58 = vor.u32 %v2755_v50, %v2574_v49 }
  0x12   :  { %568 = vmatpush.bf16.msra.mxu0 %v2527_v30  ;;  %v454_v47 = vpack.c.b16 %v399_v43, %v399_v43  ;;  %v2732_v56 = vld [vmem:[#allocation3 + $0x7c] sm:$0xf]  ;;  %v2488_v57 = vld [vmem:[#allocation3 + $0x8c] sm:$0xf0]  ;;  %v2487_v59 = vor.u32 %v2734_v48, %v2486_v45  ;;  %v2956_v60 = vor.u32 %v2703_v53, %v2372_v54  ;;  %v2729_v62 = vld [vmem:[#allocation3 + $0x60] sm:$0xf0] }
  0x13   :  { %714 = vmatpush.bf16.msra.mxu2 %v2531_v31  ;;  %v2466_v61 = vld [vmem:[#allocation3 + $0x50] sm:$0xf]  ;;  %v2554_v63 = vld [vmem:[#allocation3 + $0xf8] sm:$0xf]  ;;  %v2491_v0 = vor.u32 %v2732_v56, %v2488_v57  ;;  %v2750_v1 = vld [vmem:[#allocation3 + $0x108] sm:$0xf0] }
  0x14   :  { %v558_v55 = vand.u32 %v2926_v16, %v454_v47  ;;  %4088 = vst [vmem:[#allocation9_spill] sm:$0xff] %v2956_v60  ;;  %v2727_v2 = vld [vmem:[#allocation3 + $0x54] sm:$0xf]  ;;  %v2468_v3 = vld [vmem:[#allocation3 + $0x64] sm:$0xf0]  ;;  %v2555_v4 = vor.u32 %v2750_v1, %v2554_v63  ;;  %v2467_v5 = vor.u32 %v2729_v62, %v2466_v61  ;;  %s2880_s7 = smov 77  }
  0x15   :  { %2769 = vmatpush.bf16.msra.mxu1 %v2945_v51  ;;  %2772 = vmatpush.bf16.msra.mxu3 %v2947_v52  ;;  %v2446_v6 = vld [vmem:[#allocation3 + $0x28] sm:$0xf]  ;;  %v2724_v7 = vld [vmem:[#allocation3 + $0x38] sm:$0xf0]  ;;  %v2471_v8 = vor.u32 %v2727_v2, %v2468_v3  ;;  %v2534_v9 = vld [vmem:[#allocation3 + $0xd0] sm:$0xf] }
  0x16   :  { %569 = vmatpush.bf16.msra.mxu0 %v2507_v44  ;;  %v2745_v10 = vld [vmem:[#allocation3 + $0xe0] sm:$0xf0]  ;;  %v2614_v11 = vld [vmem:[#allocation3 + $0x170] sm:$0xf]  ;;  %v2722_v12 = vld [vmem:[#allocation3 + $0x2c] sm:$0xf]  ;;  %v2447_v17 = vor.u32 %v2724_v7, %v2446_v6 }
  0x17   :  { %715 = vmatpush.bf16.msra.mxu2 %v2511_v46  ;;  %v2448_v13 = vld [vmem:[#allocation3 + $0x3c] sm:$0xf0]  ;;  %v2535_v14 = vor.u32 %v2745_v10, %v2534_v9  ;;  %v2765_v15 = vld [vmem:[#allocation3 + $0x180] sm:$0xf0]  ;;  %v2719_v20 = vld [vmem:[#allocation3 + $0x10] sm:$0xf0] }
  0x18   :  { %2629 = vmatmul.msk.bf16.vlgmr.msra.gmra.mxu1 %vm507_vm2, %v2956_v60  ;;  %2642 = vmatmul.msk.bf16.vlgmr.msra.gmra.mxu3 %vm507_vm2, %v2956_v60  ;;  %v2615_v18 = vor.u32 %v2765_v15, %v2614_v11  ;;  %v2426_v19 = vld [vmem:[#allocation3] sm:$0xf]  ;;  %v2451_v21 = vor.u32 %v2722_v12, %v2448_v13  ;;  %v2717_v22 = vld [vmem:[#allocation3 + $0x4] sm:$0xf]  ;;  %v2428_v23 = vld [vmem:[#allocation3 + $0x14] sm:$0xf0] }
  0x19   :  { %936 = vmatpush.bf16.msrb.mxu3 %v558_v55  ;;  %858 = vmatpush.bf16.msrb.mxu1 %v2575_v58  ;;  %v2427_v24 = vor.u32 %v2719_v20, %v2426_v19  ;;  %v2330_v25 = vld [vmem:[%s4049_s0] sm:$0xf]  ;;  %v2694_v26 = vld [vmem:[%s4049_s0 + $0x4] sm:$0xf0]  ;;  %v2431_v27 = vor.u32 %v2717_v22, %v2428_v23  ;;  %v2705_v30 = vld [vmem:[%s4049_s0 + $0x64] sm:$0xf] }
  0x1a   :  { %570 = vmatpush.bf16.msra.mxu0 %v2487_v59  ;;  %v2380_v31 = vld [vmem:[%s4049_s0 + $0x68] sm:$0xf0]  ;;  %v2976_v32 = vor.u32 %v2694_v26, %v2330_v25  ;;  %v2514_v34 = vld [vmem:[#allocation3 + $0xa8] sm:$0xf]  ;;  %v2740_v37 = vld [vmem:[#allocation3 + $0xb8] sm:$0xf0] }
  0x1b   :  { %716 = vmatpush.bf16.msra.mxu2 %v2491_v0  ;;  %v2978_v33 = vor.u32 %v2705_v30, %v2380_v31  ;;  %v2515_v38 = vor.u32 %v2740_v37, %v2514_v34  ;;  %v2494_v42 = vld [vmem:[#allocation3 + $0x80] sm:$0xf]  ;;  %v2735_v43 = vld [vmem:[#allocation3 + $0x90] sm:$0xf0]  ;;  %v2698_v46 = vld [vmem:[%s4049_s0 + $0x24] sm:$0xf0] }
  0x1c   :  { %v2495_v44 = vor.u32 %v2735_v43, %v2494_v42  ;;  %v2346_v45 = vld [vmem:[%s4049_s0 + $0x20] sm:$0xf]  ;;  %v2709_v47 = vld [vmem:[%s4049_s0 + $0x84] sm:$0xf]  ;;  %v2396_v48 = vld [vmem:[%s4049_s0 + $0x88] sm:$0xf0] }
  0x1d   :  { %859 = vmatpush.bf16.msrb.mxu1 %v2555_v4  ;;  %937 = vmatpush.bf16.msrb.mxu3 %v2615_v18  ;;  %4089 = vst [vmem:[#allocation10_spill] sm:$0xff] %v2978_v33  ;;  %v3026_v49 = vor.u32 %v2698_v46, %v2346_v45  ;;  %v3028_v50 = vor.u32 %v2709_v47, %v2396_v48  ;;  %v2594_v53 = vld [vmem:[#allocation3 + $0x148] sm:$0xf]  ;;  %v2760_v55 = vld [vmem:[#allocation3 + $0x158] sm:$0xf0]  ;;  %v3105_v22 = vld [vmem:[%s4049_s0 + $0xc0] sm:$0xff] }
  0x1e   :  { %571 = vmatpush.bf16.msra.mxu0 %v2467_v5  ;;  %v2595_v56 = vor.u32 %v2760_v55, %v2594_v53  ;;  %v2354_v57 = vld [vmem:[%s4049_s0 + $0x30] sm:$0xf]  ;;  %v2700_v58 = vld [vmem:[%s4049_s0 + $0x34] sm:$0xf0]  ;;  %v2711_v59 = vld [vmem:[%s4049_s0 + $0x94] sm:$0xf]  ;;  %v194_v31 = vunpack.c.h.b16 %v3105_v22 }
  0x1f   :  { %717 = vmatpush.bf16.msra.mxu2 %v2471_v8  ;;  %v2404_v61 = vld [vmem:[%s4049_s0 + $0x98] sm:$0xf0]  ;;  %v3048_v62 = vor.u32 %v2700_v58, %v2354_v57  ;;  %v2454_v0 = vld [vmem:[#allocation3 + $0x30] sm:$0xf]  ;;  %v2725_v1 = vld [vmem:[#allocation3 + $0x40] sm:$0xf0] }
  0x20   :  { %v3050_v63 = vor.u32 %v2711_v59, %v2404_v61  ;;  %v2455_v2 = vor.u32 %v2725_v1, %v2454_v0  ;;  %v2362_v3 = vld [vmem:[%s4049_s0 + $0x40] sm:$0xf]  ;;  %v2702_v4 = vld [vmem:[%s4049_s0 + $0x44] sm:$0xf0]  ;;  %v2713_v5 = vld [vmem:[%s4049_s0 + $0xa4] sm:$0xf]  ;;  %v3117_v37 = vpack.c.b16 %v194_v31, %v194_v31 }
  0x21   :  { %860 = vmatpush.bf16.msrb.mxu1 %v2535_v14  ;;  %938 = vmatpush.bf16.msrb.mxu3 %v2595_v56  ;;  %v2412_v6 = vld [vmem:[%s4049_s0 + $0xa8] sm:$0xf0]  ;;  %v3070_v7 = vor.u32 %v2702_v4, %v2362_v3  ;;  %v2434_v9 = vld [vmem:[#allocation3 + $0x8] sm:$0xf]  ;;  %v2720_v10 = vld [vmem:[#allocation3 + $0x18] sm:$0xf0] }
  0x22   :  { %572 = vmatpush.bf16.msra.mxu0 %v2447_v17  ;;  %v3072_v8 = vor.u32 %v2713_v5, %v2412_v6  ;;  %v2435_v11 = vor.u32 %v2720_v10, %v2434_v9  ;;  %v2370_v12 = vld [vmem:[%s4049_s0 + $0x50] sm:$0xf]  ;;  %v2704_v13 = vld [vmem:[%s4049_s0 + $0x54] sm:$0xf0]  ;;  %v2715_v14 = vld [vmem:[%s4049_s0 + $0xb4] sm:$0xf] }
  0x23   :  { %718 = vmatpush.bf16.msra.mxu2 %v2451_v21  ;;  %v2420_v15 = vld [vmem:[%s4049_s0 + $0xb8] sm:$0xf0]  ;;  %v3092_v17 = vor.u32 %v2704_v13, %v2370_v12  ;;  %v119_v19 = vld [vmem:[#allocation3 + $0x1a0] sm:$0xf]  ;;  %v2582_v23 = vld [vmem:[#allocation3 + $0x128] sm:$0xf] }
  0x24   :  { %v3094_v18 = vor.u32 %v2715_v14, %v2420_v15  ;;  %v401_v20 = vunpack.c.l.b16 %v119_v19  ;;  %v2706_v30 = vld [vmem:[%s4049_s0 + $0x64] sm:$0xf0]  ;;  %v2693_v42 = vld [vmem:[%s4049_s0 + $0x4] sm:$0xf]  ;;  %v2332_v43 = vld [vmem:[%s4049_s0 + $0x8] sm:$0xf0] }
  0x25   :  { %861 = vmatpush.bf16.msrb.mxu1 %v2515_v38  ;;  %4090 = vst [vmem:[#allocation11_spill] sm:$0xff] %v3092_v17  ;;  %v1425_v38 = vld [vmem:[%s4051_s2] sm:$0xff]  ;;  %v3144_v45 = vor.u32 %v2693_v42, %v2332_v43  ;;  %v2751_v47 = vld [vmem:[#allocation3 + $0x110] sm:$0xf0]  ;;  %v2340_v57 = vld [vmem:[%s4049_s0 + $0x18] sm:$0xf0] }
  0x26   :  { %573 = vmatpush.bf16.msra.mxu0 %v2427_v24  ;;  %v456_v21 = vpack.c.b16 %v401_v20, %v401_v20  ;;  %v2756_v24 = vld [vmem:[#allocation3 + $0x138] sm:$0xf0]  ;;  %v2562_v46 = vld [vmem:[#allocation3 + $0x100] sm:$0xf]  ;;  %v2695_v56 = vld [vmem:[%s4049_s0 + $0x14] sm:$0xf] }
  0x27   :  { %719 = vmatpush.bf16.msra.mxu2 %v2431_v27  ;;  %v2583_v26 = vor.u32 %v2756_v24, %v2582_v23  ;;  %v2378_v27 = vld [vmem:[%s4049_s0 + $0x60] sm:$0xf]  ;;  %v2563_v48 = vor.u32 %v2751_v47, %v2562_v46  ;;  %v3175_v0 = vor.u32 %v2695_v56, %v2340_v57  ;;  %v2542_v5 = vld [vmem:[#allocation3 + $0xd8] sm:$0xf]  ;;  %v2746_v6 = vld [vmem:[#allocation3 + $0xe8] sm:$0xf0] }
  0x28   :  { %2630 = vmatmul.msk.bf16.gmra.mxu1 %vm507_vm2, %v2978_v33  ;;  %2643 = vmatmul.msk.bf16.gmra.mxu3 %vm507_vm2, %v2978_v33  ;;  %v564_v25 = vand.u32 %v2926_v16, %v456_v21  ;;  %v3115_v34 = vor.u32 %v2706_v30, %v2378_v27  ;;  %v2394_v53 = vld [vmem:[%s4049_s0 + $0x80] sm:$0xf]  ;;  %v2543_v9 = vor.u32 %v2746_v6, %v2542_v5  ;;  %v2402_v10 = vld [vmem:[%s4049_s0 + $0x90] sm:$0xf]  ;;  %v2697_v13 = vld [vmem:[%s4049_s0 + $0x24] sm:$0xf] }
  0x29   :  { %574 = vmatmul.bf16.vlgmr.msra.gmra.mxu0 %v2976_v32  ;;  %862 = vmatpush.bf16.msrb.mxu1 %v2495_v44  ;;  %v2348_v14 = vld [vmem:[%s4049_s0 + $0x28] sm:$0xf0]  ;;  %v2622_v30 = vld [vmem:[#allocation3 + $0x178] sm:$0xf]  ;;  %v2699_v42 = vld [vmem:[%s4049_s0 + $0x34] sm:$0xf] }
  0x2a   :  { %644 = vmatpush.bf16.msrb.mxu0 %v2929_v28  ;;  %720 = vmatmul.bf16.vlgmr.msra.gmra.mxu2 %v2976_v32  ;;  %v2338_v28 = vld [vmem:[%s4049_s0 + $0x10] sm:$0xf]  ;;  %4091 = vst [vmem:[#allocation12_spill] sm:$0xff] %v3115_v34  ;;  %v3212_v23 = vor.u32 %v2697_v13, %v2348_v14  ;;  %v2766_v31 = vld [vmem:[#allocation3 + $0x188] sm:$0xf0]  ;;  %s2881_s8 = smov 76  }
  0x2b   :  { %790 = vmatpush.bf16.msrb.mxu2 %v2932_v29  ;;  %v2696_v29 = vld [vmem:[%s4049_s0 + $0x14] sm:$0xf0]  ;;  %1228 = vmatpush.bf16.msra.mxu3 %v564_v25  ;;  %v2356_v43 = vld [vmem:[%s4049_s0 + $0x38] sm:$0xf0]  ;;  %v2522_v6 = vld [vmem:[#allocation3 + $0xb0] sm:$0xf] }
  0x2c   :  { %v3004_v40 = vor.u32 %v2696_v29, %v2338_v28  ;;  %v2876_v28 = vmov 0   ;;  %v2386_v29 = vld [vmem:[%s4049_s0 + $0x70] sm:$0xf]  ;;  %v2716_v14 = vld [vmem:[%s4049_s0 + $0xb4] sm:$0xf0]  ;;  %s2882_s9 = smov 56  }
  0x2d   :  { %2803 = vset.pattern.permute.xlu0 %v2876_v28  ;;  %v2410_v28 = vld [vmem:[%s4049_s0 + $0xa0] sm:$0xf]  ;;  %v2418_v13 = vld [vmem:[%s4049_s0 + $0xb0] sm:$0xf]  ;;  %s2883_s10 = smov 127   ;;  %s2884_s11 = smov 54  }
  0x2e   :  { %645 = vmatpush.bf16.msrb.mxu0 %v2936_v35  ;;  %v2707_v35 = vld [vmem:[%s4049_s0 + $0x74] sm:$0xf]  ;;  %1428 = vperm.xlu0 %2803, %v1425_v38   ;;  %v2623_v38 = vor.u32 %v2766_v31, %v2622_v30  ;;  %v3270_v30 = vor.u32 %v2716_v14, %v2418_v13  ;;  %v2701_v31 = vld [vmem:[%s4049_s0 + $0x44] sm:$0xf]  ;;  %s2885_s12 = smov 126   ;;  %s2886_s13 = smov 55  }
  0x2f   :  { %791 = vmatpush.bf16.msrb.mxu2 %v2938_v36  ;;  %v2388_v36 = vld [vmem:[%s4049_s0 + $0x78] sm:$0xf0]  ;;  %s2887_s14 = smov 125   ;;  %s2888_s15 = smov 124   ;;  %vm1455_vm3 = vcmask 1039360   ;;  %vm1488_vm4 = vcmask 1031168  }
  0x30   :  { %v3006_v41 = vor.u32 %v2707_v35, %v2388_v36  ;;  %v2708_v35 = vld [vmem:[%s4049_s0 + $0x74] sm:$0xf0]  ;;  %1229 = vmatpush.bf16.msra.mxu3 %v2623_v38  ;;  %v2364_v38 = vld [vmem:[%s4049_s0 + $0x48] sm:$0xf0]  ;;  %s2889_s16 = smov 53   ;;  %s2890_s17 = smov 104  }
  0x31   :  { %v3134_v36 = vor.u32 %v2708_v35, %v2386_v29  ;;  %v2714_v29 = vld [vmem:[%s4049_s0 + $0xa4] sm:$0xf0]  ;;  %s2891_s18 = smov 52   ;;  %s2892_s1 = smov 32   ;;  %vm1521_vm5 = vcmask 1022976   ;;  %vm1554_vm6 = vcmask 1014784  }
  0x32   :  { %646 = vmatpush.bf16.msrb.mxu0 %v2945_v51  ;;  %v2474_v51 = vld [vmem:[#allocation3 + $0x58] sm:$0xf]  ;;  %v3233_v35 = vor.u32 %v2714_v29, %v2410_v28  ;;  %s2893_s19 = smov 103   ;;  %s2894_s20 = smov 102   ;;  %vm1587_vm7 = vcmask 850944   ;;  %vm1620_vm8 = vcmask 842752  }
  0x33   :  { %792 = vmatpush.bf16.msrb.mxu2 %v2947_v52  ;;  %v2730_v52 = vld [vmem:[#allocation3 + $0x68] sm:$0xf0]  ;;  %s2895_s21 = smov 31   ;;  %s2896_s22 = smov 101   ;;  %vm1653_vm9 = vcmask 834560   ;;  %vm1686_vm10 = vcmask 826368  }
  0x34   :  { %v2475_v54 = vor.u32 %v2730_v52, %v2474_v51  ;;  %s2897_s23 = smov 30   ;;  %s2898_s24 = smov 29   ;;  %vm1719_vm11 = vcmask 818176   ;;  %vm1752_vm12 = vcmask 654336   ;;  %vm1785_vm13 = vcmask 646144  }
  0x35   :  { %s2899_s25 = smov 100   ;;  %s2900_s26 = smov 28   ;;  %vm4080_vm14 = vcmask 637952   ;;  %vm4077_vm15 = vcmask 629760   ;;  %vm4078_vm0 = vcmask 621568   ;;  %vm4079_vm1 = vcmask 457728  }
  0x36   :  { %863 = vmatpush.bf16.msrb.mxu1 %v2475_v54  ;;  %v2710_v54 = vld [vmem:[%s4049_s0 + $0x84] sm:$0xf0]  ;;  %s2901_s27 = smov [#allocation6]   ;;  %s2318_s30 = sshll.u32 %s4052_s3, 4  ;;  %s2319_s30 = int_to_ptr.hbm [resolvable:$true] %s2318_s30 }
  0x37   :  { %v3161_v55 = vor.u32 %v2710_v54, %v2394_v53  ;;  %v3249_v54 = vor.u32 %v2699_v42, %v2356_v43  ;;  %s2316_s28 = sshll.u32 %s2901_s27, 4  ;;  %s2317_s28 = int_to_ptr.vmem [resolvable:$true] %s2316_s28 }
  0x38   :  { %2631 = vmatmul.msk.bf16.gmra.mxu1 %vm507_vm2, %v3006_v41  ;;  %2644 = vmatmul.msk.bf16.gmra.mxu3 %vm507_vm2, %v3006_v41 }
  0x39   :  { %579 = vmatmul.bf16.gmra.mxu0 %v3004_v40 }
  0x3a   :  { %725 = vmatmul.bf16.gmra.mxu2 %v3004_v40  ;;  %864 = vmatpush.bf16.msrb.mxu1 %v2455_v2 }
  0x3e   :  { %865 = vmatpush.bf16.msrb.mxu1 %v2435_v11  ;;  %v2712_v11 = vld [vmem:[%s4049_s0 + $0x94] sm:$0xf0]  ;;  %s2877_s0 = smov 80  }
  0x3f   :  { %v3196_v12 = vor.u32 %v2712_v11, %v2402_v10 }
  0x42   :  { %1150 = vmatpush.bf16.msra.mxu1 %v2583_v26 }
  0x46   :  { %1151 = vmatpush.bf16.msra.mxu1 %v2563_v48 }
  0x48   :  { %2632 = vmatmul.msk.bf16.gmra.mxu1 %vm507_vm2, %v3028_v50  ;;  %2645 = vmatmul.msk.bf16.gmra.mxu3 %vm507_vm2, %v3028_v50 }
  0x49   :  { %584 = vmatmul.bf16.gmra.mxu0 %v3026_v49 }
  0x4a   :  { %730 = vmatmul.bf16.gmra.mxu2 %v3026_v49  ;;  %1152 = vmatpush.bf16.msra.mxu1 %v2543_v9  ;;  %v2741_v9 = vld [vmem:[#allocation3 + $0xc0] sm:$0xf0] }
  0x4b   :  { %v2523_v11 = vor.u32 %v2741_v9, %v2522_v6  ;;  %v3286_v6 = vor.u32 %v2701_v31, %v2364_v38  ;;  %v193_v31 = vunpack.c.l.b16 %v3105_v22 }
  0x4d   :  { %v3302_v38 = vpack.c.b16 %v193_v31, %v193_v31 }
  0x4e   :  { %1153 = vmatpush.bf16.msra.mxu1 %v2523_v11 }
  0x58   :  { %2633 = vmatmul.msk.bf16.gmra.mxu1 %vm507_vm2, %v3050_v63  ;;  %2646 = vmatmul.msk.bf16.gmra.mxu3 %vm507_vm2, %v3050_v63 }
  0x59   :  { %589 = vmatmul.bf16.gmra.mxu0 %v3048_v62 }
  0x5a   :  { %735 = vmatmul.bf16.gmra.mxu2 %v3048_v62 }
  0x68   :  { %2634 = vmatmul.msk.bf16.gmra.mxu1 %vm507_vm2, %v3072_v8  ;;  %2647 = vmatmul.msk.bf16.gmra.mxu3 %vm507_vm2, %v3072_v8 }
  0x69   :  { %594 = vmatmul.bf16.gmra.mxu0 %v3070_v7 }
  0x6a   :  { %740 = vmatmul.bf16.gmra.mxu2 %v3070_v7 }
  0x78   :  { %2635 = vmatmul.msk.bf16.gmra.mxu1 %vm507_vm2, %v3094_v18  ;;  %2648 = vmatmul.msk.bf16.gmra.mxu3 %vm507_vm2, %v3094_v18 }
  0x79   :  { %599 = vmatmul.bf16.gmra.mxu0 %v3092_v17 }
  0x7a   :  { %745 = vmatmul.bf16.gmra.mxu2 %v3092_v17 }
  0x88   :  { %2636 = vmatmul.msk.bf16.gmra.mxu1 %vm507_vm2, %v3117_v37  ;;  %2649 = vmatmul.msk.bf16.gmra.mxu3 %vm507_vm2, %v3117_v37 }
  0x89   :  { %604 = vmatmul.bf16.gmra.mxu0 %v3115_v34 }
  0x8a   :  { %750 = vmatmul.bf16.gmra.mxu2 %v3115_v34 }
  0x95   :  { %v3142_v44 = vpop.f32.mrf.mxu1 }
  0x98   :  { %866 = vmatmul.bf16.vlgmr.msrb.gmra.mxu1 %v2976_v32  ;;  %2650 = vmatmul.msk.bf16.vlgmr.msrb.gmra.mxu3 %vm507_vm2, %v3144_v45 }
  0x99   :  { %609 = vmatmul.bf16.gmra.mxu0 %v3134_v36 }
  0x9a   :  { %755 = vmatmul.bf16.gmra.mxu2 %v3134_v36 }
  0x9b   :  { %v3151_v51 = vpop.f32.mrf.mxu3 }
  0x9d   :  { %v3153_v52 = vpop.f32.mrf.mxu1 }
  0xa3   :  { %v3169_v58 = vpop.f32.mrf.mxu3 }
  0xa5   :  { %v3173_v61 = vpop.f32.mrf.mxu1 }
  0xa6   :  { %v3171_v59 = vpop.f32.mrf.mxu0 }
  0xa7   :  { %4092 = vst [vmem:[#allocation13_spill] sm:$0xff] %v3171_v59 }
  0xa8   :  { %871 = vmatmul.bf16.gmra.mxu1 %v3004_v40  ;;  %2651 = vmatmul.msk.bf16.gmra.mxu3 %vm507_vm2, %v3175_v0 }
  0xa9   :  { %614 = vmatmul.bf16.gmra.mxu0 %v3161_v55 }
  0xaa   :  { %760 = vmatmul.bf16.gmra.mxu2 %v3161_v55 }
  0xab   :  { %v3186_v3 = vpop.f32.mrf.mxu3 }
  0xad   :  { %v3182_v1 = vpop.f32.mrf.mxu2  ;;  %v3188_v4 = vpop.f32.mrf.mxu1 }
  0xae   :  { %4093 = vst [vmem:[#allocation14_spill] sm:$0xff] %v3182_v1  ;;  %v3184_v2 = vpop.f32.mrf.mxu0 }
  0xb3   :  { %v3208_v20 = vpop.f32.mrf.mxu3 }
  0xb5   :  { %v3204_v15 = vpop.f32.mrf.mxu2  ;;  %v3210_v21 = vpop.f32.mrf.mxu1 }
  0xb6   :  { %v3206_v19 = vpop.f32.mrf.mxu0 }
  0xb8   :  { %876 = vmatmul.bf16.gmra.mxu1 %v3026_v49  ;;  %2652 = vmatmul.msk.bf16.gmra.mxu3 %vm507_vm2, %v3212_v23 }
  0xb9   :  { %619 = vmatmul.bf16.gmra.mxu0 %v3196_v12 }
  0xba   :  { %765 = vmatmul.bf16.gmra.mxu2 %v3196_v12 }
  0xbb   :  { %v3223_v26 = vpop.f32.mrf.mxu3 }
  0xbd   :  { %v3219_v24 = vpop.f32.mrf.mxu2  ;;  %v3225_v27 = vpop.f32.mrf.mxu1 }
  0xbe   :  { %v3221_v25 = vpop.f32.mrf.mxu0 }
  0xbf   :  { %4094 = vst [vmem:[#allocation15_spill] sm:$0xff] %v3221_v25  ;;  %v2602_v25 = vld [vmem:[#allocation3 + $0x150] sm:$0xf] }
  0xc3   :  { %v3245_v48 = vpop.f32.mrf.mxu3 }
  0xc5   :  { %v3241_v46 = vpop.f32.mrf.mxu2  ;;  %v3247_v53 = vpop.f32.mrf.mxu1 }
  0xc6   :  { %4095 = vst [vmem:[#allocation16_spill] sm:$0xff] %v3241_v46  ;;  %v3243_v47 = vpop.f32.mrf.mxu0 }
  0xc7   :  { %4096 = vst [vmem:[#allocation17_spill] sm:$0xff] %v3243_v47 }
  0xc8   :  { %881 = vmatmul.bf16.gmra.mxu1 %v3048_v62  ;;  %2653 = vmatmul.msk.bf16.gmra.mxu3 %vm507_vm2, %v3249_v54 }
  0xc9   :  { %624 = vmatmul.bf16.gmra.mxu0 %v3233_v35 }
  0xca   :  { %770 = vmatmul.bf16.gmra.mxu2 %v3233_v35 }
  0xcb   :  { %v3260_v5 = vpop.f32.mrf.mxu3 }
  0xcd   :  { %v3256_v56 = vpop.f32.mrf.mxu2  ;;  %v3262_v10 = vpop.f32.mrf.mxu1 }
  0xce   :  { %4097 = vst [vmem:[#allocation18_spill] sm:$0xff] %v3256_v56  ;;  %v3258_v57 = vpop.f32.mrf.mxu0 }
  0xcf   :  { %4098 = vst [vmem:[#allocation19_spill] sm:$0xff] %v3258_v57 }
  0xd3   :  { %v3282_v42 = vpop.f32.mrf.mxu3 }
  0xd5   :  { %v3278_v28 = vpop.f32.mrf.mxu2  ;;  %v3284_v43 = vpop.f32.mrf.mxu1 }
  0xd6   :  { %4099 = vst [vmem:[#allocation20_spill] sm:$0xff] %v3278_v28  ;;  %v3280_v29 = vpop.f32.mrf.mxu0  ;;  %v2502_v28 = vld [vmem:[#allocation3 + $0x88] sm:$0xf] }
  0xd7   :  { %4100 = vst [vmem:[#allocation21_spill] sm:$0xff] %v3280_v29 }
  0xd8   :  { %886 = vmatmul.bf16.gmra.mxu1 %v3070_v7  ;;  %2654 = vmatmul.msk.bf16.gmra.mxu3 %vm507_vm2, %v3286_v6 }
  0xd9   :  { %629 = vmatmul.bf16.gmra.mxu0 %v3270_v30 }
  0xda   :  { %775 = vmatmul.bf16.gmra.mxu2 %v3270_v30 }
  0xdb   :  { %v3297_v13 = vpop.f32.mrf.mxu3 }
  0xdd   :  { %v3293_v9 = vpop.f32.mrf.mxu2  ;;  %v3299_v14 = vpop.f32.mrf.mxu1 }
  0xde   :  { %4101 = vst [vmem:[#allocation22_spill] sm:$0xff] %v3293_v9  ;;  %v3295_v11 = vpop.f32.mrf.mxu0  ;;  %v2736_v9 = vld [vmem:[#allocation3 + $0x98] sm:$0xf0] }
  0xdf   :  { %4102 = vst [vmem:[#allocation23_spill] sm:$0xff] %v3295_v11  ;;  %v400_v11 = vunpack.c.h.b16 %v2940_v39  ;;  %v2503_v47 = vor.u32 %v2736_v9, %v2502_v28 }
  0xe1   :  { %1154 = vmatpush.bf16.msra.mxu1 %v2503_v47  ;;  %v455_v22 = vpack.c.b16 %v400_v11, %v400_v11  ;;  %v2753_v11 = vld [vmem:[#allocation3 + $0x124] sm:$0xf] }
  0xe3   :  { %v3308_v29 = vpop.f32.mrf.mxu3  ;;  %v561_v39 = vand.u32 %v2926_v16, %v455_v22 }
  0xe5   :  { %v3304_v59 = vpop.f32.mrf.mxu2  ;;  %v3310_v57 = vpop.f32.mrf.mxu1  ;;  %1082 = vmatpush.bf16.msra.mxu2 %v561_v39 }
  0xe6   :  { %4103 = vst [vmem:[#allocation24_spill] sm:$0xff] %v3304_v59  ;;  %v3306_v1 = vpop.f32.mrf.mxu0 }
  0xe7   :  { %4104 = vst [vmem:[#allocation25_spill] sm:$0xff] %v3306_v1 }
  0xe8   :  { %891 = vmatmul.bf16.gmra.mxu1 %v3092_v17  ;;  %2655 = vmatmul.msk.bf16.gmra.mxu3 %vm507_vm2, %v2956_v60 }
  0xe9   :  { %634 = vmatmul.bf16.gmra.mxu0 %v3302_v38 }
  0xea   :  { %780 = vmatmul.bf16.gmra.mxu2 %v3302_v38 }
  0xeb   :  { %v3322_v59 = vpop.f32.mrf.mxu3 }
  0xed   :  { %v3318_v31 = vpop.f32.mrf.mxu2  ;;  %v3324_v56 = vpop.f32.mrf.mxu1 }
  0xee   :  { %4105 = vst [vmem:[#allocation26_spill] sm:$0xff] %v3318_v31  ;;  %v3320_v1 = vpop.f32.mrf.mxu0  ;;  %v2576_v31 = vld [vmem:[#allocation3 + $0x134] sm:$0xf0] }
  0xef   :  { %4106 = vst [vmem:[#allocation27_spill] sm:$0xff] %v3320_v1  ;;  %v2579_v1 = vor.u32 %v2753_v11, %v2576_v31  ;;  %v2748_v31 = vld [vmem:[#allocation3 + $0xfc] sm:$0xf]  ;;  %v2556_v11 = vld [vmem:[#allocation3 + $0x10c] sm:$0xf0] }
  0xf1   :  { %1004 = vmatpush.bf16.msra.mxu0 %v2579_v1  ;;  %v2731_v1 = vld [vmem:[#allocation3 + $0x70] sm:$0xf0] }
  0xf3   :  { %v3329_v17 = vpop.f32.mrf.mxu3 }
  0xf5   :  { %v3327_v28 = vpop.f32.mrf.mxu2  ;;  %v3332_v47 = vpop.f32.mrf.mxu1 }
  0xf6   :  { %4107 = vst [vmem:[#allocation28_spill] sm:$0xff] %v3327_v28  ;;  %v600_v9 = vpop.f32.mrf.mxu0  ;;  %v2482_v28 = vld [vmem:[#allocation3 + $0x60] sm:$0xf] }
  0xf7   :  { %v674_v60 = vadd.f32 %v3142_v44, %v600_v9 }
  0xf8   :  { %896 = vmatmul.bf16.gmra.mxu1 %v3115_v34  ;;  %2656 = vmatmul.msk.bf16.gmra.mxu3 %vm507_vm2, %v2978_v33  ;;  %v2559_v34 = vor.u32 %v2748_v31, %v2556_v11  ;;  %v2483_v33 = vor.u32 %v2731_v1, %v2482_v28 }
  0xf9   :  { %1742 = vrot.lane.b32.xlu1 %v674_v60, %s2877_s0  ;;  %2624 = vmatmul.msk.bf16.vlgmr.msrb.gmra.mxu0 %vm507_vm2, %v3144_v45 }
  0xfa   :  { %2637 = vmatmul.msk.bf16.vlgmr.msrb.gmra.mxu2 %vm507_vm2, %v3144_v45  ;;  %1005 = vmatpush.bf16.msra.mxu0 %v2559_v34  ;;  %v2536_v34 = vld [vmem:[#allocation3 + $0xe4] sm:$0xf0] }
  0xfb   :  { %v3343_v39 = vpop.f32.mrf.mxu3  ;;  %1155 = vmatpush.bf16.msra.mxu1 %v2483_v33  ;;  %v2743_v33 = vld [vmem:[#allocation3 + $0xd4] sm:$0xf] }
  0xfd   :  { %v746_v16 = vpop.f32.mrf.mxu2  ;;  %v3346_v9 = vpop.f32.mrf.mxu1 }
  0xfe   :  { %v602_v44 = vpop.f32.mrf.mxu0  ;;  %v820_v22 = vadd.f32 %v3151_v51, %v746_v16 }
  0xff   :  { %v676_v60 = vadd.f32 %v3153_v52, %v602_v44 }
 0x100   :  { %1744 = vrot.lane.b32.xlu2 %v820_v22, %s2877_s0 }
 0x101   :  { %1775 = vrot.lane.b32.xlu0 %v676_v60, %s2878_s5  ;;  %v2761_v60 = vld [vmem:[#allocation3 + $0x160] sm:$0xf0] }
 0x102   :  { %v2603_v28 = vor.u32 %v2761_v60, %v2602_v25 }
 0x103   :  { %v3351_v52 = vpop.f32.mrf.mxu3 }
 0x104   :  { %1230 = vmatpush.bf16.msra.mxu3 %v2603_v28 }
 0x105   :  { %v748_v51 = vpop.f32.mrf.mxu2  ;;  %v3354_v22 = vpop.f32.mrf.mxu1 }
 0x106   :  { %v605_v16 = vpop.f32.mrf.mxu0  ;;  %v822_v46 = vadd.f32 %v3169_v58, %v748_v51  ;;  %v2539_v58 = vor.u32 %v2743_v33, %v2536_v34  ;;  %v2763_v51 = vld [vmem:[#allocation3 + $0x174] sm:$0xf] }
 0x107   :  { %v679_v44 = vadd.f32 %v3173_v61, %v605_v16  ;;  %v2616_v16 = vld [vmem:[#allocation3 + $0x184] sm:$0xf0] }
 0x108   :  { %1777 = vrot.lane.b32.xlu1 %v822_v46, %s2878_s5  ;;  %901 = vmatmul.bf16.gmra.mxu1 %v3134_v36 }
 0x109   :  { %1808 = vrot.lane.b32.xlu2 %v679_v44, %s2879_s6  ;;  %2625 = vmatmul.msk.bf16.gmra.mxu0 %vm507_vm2, %v3175_v0  ;;  %v2619_v44 = vor.u32 %v2763_v51, %v2616_v16 }
 0x10a   :  { %2638 = vmatmul.msk.bf16.gmra.mxu2 %vm507_vm2, %v3175_v0  ;;  %2657 = vmatmul.msk.bf16.gmra.mxu3 %vm507_vm2, %v3006_v41 }
 0x10b   :  { %v3366_v25 = vpop.f32.mrf.mxu3  ;;  %1006 = vmatpush.bf16.msra.mxu0 %v2539_v58  ;;  %1083 = vmatpush.bf16.msra.mxu2 %v2619_v44  ;;  %v2516_v58 = vld [vmem:[#allocation3 + $0xbc] sm:$0xf0] }
 0x10d   :  { %v751_v61 = vpop.f32.mrf.mxu2  ;;  %v710_v1 = vpop.f32.mrf.mxu1 }
 0x10e   :  { %v607_v46 = vpop.f32.mrf.mxu0  ;;  %v825_v31 = vadd.f32 %v3186_v3, %v751_v61 }
 0x10f   :  { %v681_v11 = vadd.f32 %v3188_v4, %v607_v46  ;;  %v2738_v4 = vld [vmem:[#allocation3 + $0xac] sm:$0xf] }
 0x110   :  { %1810 = vrot.lane.b32.xlu0 %v825_v31, %s2879_s6  ;;  %v2519_v46 = vor.u32 %v2738_v4, %v2516_v58  ;;  %v2728_v4 = vld [vmem:[#allocation3 + $0x5c] sm:$0xf]  ;;  %v2476_v58 = vld [vmem:[#allocation3 + $0x6c] sm:$0xf0] }
 0x111   :  { %1841 = vrot.lane.b32.xlu1 %v681_v11, %s2880_s7 }
 0x112   :  { %1007 = vmatpush.bf16.msra.mxu0 %v2519_v46 }
 0x113   :  { %v856_v3 = vpop.f32.mrf.mxu3 }
 0x114   :  { %v2496_v3 = vld [vmem:[#allocation3 + $0x94] sm:$0xf0] }
 0x115   :  { %v753_v60 = vpop.f32.mrf.mxu2  ;;  %v867_v61 = vpop.f32.mrf.mxu1 }
 0x116   :  { %v610_v28 = vpop.f32.mrf.mxu0  ;;  %v827_v33 = vadd.f32 %v3208_v20, %v753_v60  ;;  %v2462_v20 = vld [vmem:[#allocation3 + $0x38] sm:$0xf] }
 0x117   :  { %v684_v34 = vadd.f32 %v3210_v21, %v610_v28  ;;  %v2726_v21 = vld [vmem:[#allocation3 + $0x48] sm:$0xf0] }
 0x118   :  { %1843 = vrot.lane.b32.xlu2 %v827_v33, %s2880_s7  ;;  %906 = vmatmul.bf16.gmra.mxu1 %v3161_v55  ;;  %v2463_v31 = vor.u32 %v2726_v21, %v2462_v20  ;;  %v2733_v33 = vld [vmem:[#allocation3 + $0x84] sm:$0xf]  ;;  %v2479_v20 = vor.u32 %v2728_v4, %v2476_v58 }
 0x119   :  { %1874 = vrot.lane.b32.xlu0 %v684_v34, %s2881_s8  ;;  %2626 = vmatmul.msk.bf16.gmra.mxu0 %vm507_vm2, %v3212_v23  ;;  %v2499_v34 = vor.u32 %v2733_v33, %v2496_v3 }
 0x11a   :  { %2639 = vmatmul.msk.bf16.gmra.mxu2 %vm507_vm2, %v3212_v23  ;;  %2658 = vmatmul.msk.bf16.gmra.mxu3 %vm507_vm2, %v3028_v50 }
 0x11b   :  { %v940_v16 = vpop.f32.mrf.mxu3  ;;  %1156 = vmatpush.bf16.msra.mxu1 %v2463_v31  ;;  %1008 = vmatpush.bf16.msra.mxu0 %v2499_v34  ;;  %v2596_v31 = vld [vmem:[#allocation3 + $0x15c] sm:$0xf0] }
 0x11c   :  { %v3384_v60 = vadd.f32 %v940_v16, %v867_v61  ;;  %v2758_v61 = vld [vmem:[#allocation3 + $0x14c] sm:$0xf] }
 0x11d   :  { %v756_v11 = vpop.f32.mrf.mxu2  ;;  %v869_v28 = vpop.f32.mrf.mxu1  ;;  %v2599_v16 = vor.u32 %v2758_v61, %v2596_v31 }
 0x11e   :  { %v612_v1 = vpop.f32.mrf.mxu0  ;;  %v830_v51 = vadd.f32 %v3223_v26, %v756_v11 }
 0x11f   :  { %v686_v44 = vadd.f32 %v3225_v27, %v612_v1  ;;  %1009 = vmatpush.bf16.msra.mxu0 %v2479_v20  ;;  %1084 = vmatpush.bf16.msra.mxu2 %v2599_v16 }
 0x120   :  { %1876 = vrot.lane.b32.xlu1 %v830_v51, %s2881_s8  ;;  %v2723_v51 = vld [vmem:[#allocation3 + $0x34] sm:$0xf] }
 0x121   :  { %1907 = vrot.lane.b32.xlu2 %v686_v44, %s2882_s9  ;;  %v2456_v44 = vld [vmem:[#allocation3 + $0x44] sm:$0xf0] }
 0x122   :  { %v2459_v33 = vor.u32 %v2723_v51, %v2456_v44 }
 0x123   :  { %v942_v21 = vpop.f32.mrf.mxu3 }
 0x124   :  { %v943_v11 = vadd.f32 %v942_v21, %v869_v28  ;;  %1010 = vmatpush.bf16.msra.mxu0 %v2459_v33  ;;  %v2436_v28 = vld [vmem:[#allocation3 + $0x1c] sm:$0xf0] }
 0x125   :  { %v758_v46 = vpop.f32.mrf.mxu2  ;;  %v872_v1 = vpop.f32.mrf.mxu1 }
 0x126   :  { %v615_v26 = vpop.f32.mrf.mxu0  ;;  %v832_v27 = vadd.f32 %v3245_v48, %v758_v46  ;;  %v2718_v48 = vld [vmem:[#allocation3 + $0xc] sm:$0xf] }
 0x127   :  { %v2439_v4 = vor.u32 %v2718_v48, %v2436_v28  ;;  %v689_v20 = vadd.f32 %v3247_v53, %v615_v26  ;;  %v2442_v53 = vld [vmem:[#allocation3 + $0x10] sm:$0xf]  ;;  %v2721_v26 = vld [vmem:[#allocation3 + $0x20] sm:$0xf0] }
 0x128   :  { %1909 = vrot.lane.b32.xlu0 %v832_v27, %s2882_s9  ;;  %1449 = vrot.lane.b32.xlu1 %v943_v11, %s2883_s10 }
 0x129   :  { %2627 = vmatmul.msk.bf16.gmra.mxu0 %vm507_vm2, %v3249_v54  ;;  %911 = vmatmul.bf16.gmra.mxu1 %v3196_v12 }
 0x12a   :  { %2640 = vmatmul.msk.bf16.gmra.mxu2 %vm507_vm2, %v3249_v54  ;;  %2659 = vmatmul.msk.bf16.gmra.mxu3 %vm507_vm2, %v3050_v63 }
 0x12b   :  { %v945_v58 = vpop.f32.mrf.mxu3  ;;  %1011 = vmatpush.bf16.msra.mxu0 %v2439_v4 }
 0x12c   :  { %v946_v27 = vadd.f32 %v945_v58, %v872_v1  ;;  %v2443_v1 = vor.u32 %v2721_v26, %v2442_v53 }
 0x12d   :  { %v761_v3 = vpop.f32.mrf.mxu2  ;;  %v874_v21 = vpop.f32.mrf.mxu1 }
 0x12e   :  { %v617_v34 = vpop.f32.mrf.mxu0  ;;  %1482 = vrot.lane.b32.xlu2 %v946_v27, %s2885_s12  ;;  %v835_v16 = vadd.f32 %v3260_v5, %v761_v3  ;;  %1157 = vmatpush.bf16.msra.mxu1 %v2443_v1 }
 0x12f   :  { %v691_v46 = vadd.f32 %v3262_v10, %v617_v34 }
 0x130   :  { %1940 = vrot.lane.b32.xlu1 %v689_v20, %s2886_s13 }
 0x131   :  { %1973 = vrot.lane.b32.xlu0 %v691_v46, %s2884_s11 }
 0x133   :  { %v947_v11 = vpop.f32.mrf.mxu3 }
 0x134   :  { %v948_v10 = vadd.f32 %v947_v11, %v874_v21 }
 0x135   :  { %v763_v61 = vpop.f32.mrf.mxu2  ;;  %v877_v51 = vpop.f32.mrf.mxu1 }
 0x136   :  { %v620_v31 = vpop.f32.mrf.mxu0  ;;  %1942 = vrot.lane.b32.xlu2 %v835_v16, %s2886_s13  ;;  %v837_v34 = vadd.f32 %v3282_v42, %v763_v61 }
 0x137   :  { %v694_v48 = vadd.f32 %v3284_v43, %v620_v31 }
 0x138   :  { %1515 = vrot.lane.b32.xlu1 %v948_v10, %s2887_s14 }
 0x139   :  { %2628 = vmatmul.msk.bf16.gmra.mxu0 %vm507_vm2, %v3286_v6  ;;  %916 = vmatmul.bf16.gmra.mxu1 %v3233_v35 }
 0x13a   :  { %2641 = vmatmul.msk.bf16.gmra.mxu2 %vm507_vm2, %v3286_v6  ;;  %2660 = vmatmul.msk.bf16.gmra.mxu3 %vm507_vm2, %v3072_v8 }
 0x13b   :  { %v950_v33 = vpop.f32.mrf.mxu3 }
 0x13c   :  { %v951_v28 = vadd.f32 %v950_v33, %v877_v51 }
 0x13d   :  { %v766_v5 = vpop.f32.mrf.mxu2  ;;  %v879_v3 = vpop.f32.mrf.mxu1 }
 0x13e   :  { %v622_v44 = vpop.f32.mrf.mxu0  ;;  %1548 = vrot.lane.b32.xlu0 %v951_v28, %s2888_s15  ;;  %2006 = vrot.lane.b32.xlu2 %v694_v48, %s2889_s16  ;;  %v840_v20 = vadd.f32 %v3297_v13, %v766_v5 }
 0x13f   :  { %v696_v43 = vadd.f32 %v3299_v14, %v622_v44 }
 0x140   :  { %1975 = vrot.lane.b32.xlu1 %v837_v34, %s2884_s11 }
 0x143   :  { %v952_v46 = vpop.f32.mrf.mxu3 }
 0x144   :  { %v953_v27 = vadd.f32 %v952_v46, %v879_v3 }
 0x145   :  { %v768_v4 = vpop.f32.mrf.mxu2  ;;  %v882_v21 = vpop.f32.mrf.mxu1 }
 0x146   :  { %v625_v58 = vpop.f32.mrf.mxu0  ;;  %2008 = vrot.lane.b32.xlu0 %v840_v20, %s2889_s16  ;;  %1581 = vrot.lane.b32.xlu2 %v953_v27, %s2890_s17  ;;  %v842_v61 = vadd.f32 %v3308_v29, %v768_v4 }
 0x147   :  { %v699_v31 = vadd.f32 %v3310_v57, %v625_v58 }
 0x148   :  { %2039 = vrot.lane.b32.xlu1 %v696_v43, %s2891_s18 }
 0x149   :  { %921 = vmatmul.bf16.gmra.mxu1 %v3270_v30  ;;  %1012 = vmatmul.bf16.vlgmr.msra.gmra.mxu0 %v2976_v32 }
 0x14a   :  { %2663 = vmatmul.msk.bf16.vlgmr.msra.gmra.mxu2 %vm507_vm2, %v3144_v45  ;;  %2661 = vmatmul.msk.bf16.gmra.mxu3 %vm507_vm2, %v3094_v18 }
 0x14b   :  { %v955_v14 = vpop.f32.mrf.mxu3 }
 0x14c   :  { %v956_v11 = vadd.f32 %v955_v14, %v882_v21 }
 0x14d   :  { %v771_v42 = vpop.f32.mrf.mxu2  ;;  %v884_v16 = vpop.f32.mrf.mxu1 }
 0x14e   :  { %v627_v13 = vpop.f32.mrf.mxu0  ;;  %2072 = vrot.lane.b32.xlu0 %v699_v31, %s2892_s1  ;;  %2041 = vrot.lane.b32.xlu2 %v842_v61, %s2891_s18  ;;  %v845_v29 = vadd.f32 %v3322_v59, %v771_v42 }
 0x14f   :  { %v701_v26 = vadd.f32 %v3324_v56, %v627_v13 }
 0x150   :  { %1614 = vrot.lane.b32.xlu1 %v956_v11, %s2893_s19 }
 0x153   :  { %v957_v53 = vpop.f32.mrf.mxu3 }
 0x154   :  { %v958_v1 = vadd.f32 %v957_v53, %v884_v16 }
 0x155   :  { %v773_v10 = vpop.f32.mrf.mxu2  ;;  %v887_v5 = vpop.f32.mrf.mxu1 }
 0x156   :  { %v630_v51 = vpop.f32.mrf.mxu0  ;;  %1647 = vrot.lane.b32.xlu0 %v958_v1, %s2894_s20  ;;  %2105 = vrot.lane.b32.xlu2 %v701_v26, %s2895_s21  ;;  %v847_v44 = vadd.f32 %v3329_v17, %v773_v10 }
 0x157   :  { %v704_v28 = vadd.f32 %v3332_v47, %v630_v51 }
 0x158   :  { %2074 = vrot.lane.b32.xlu1 %v845_v29, %s2892_s1 }
 0x159   :  { %926 = vmatmul.bf16.gmra.mxu1 %v3302_v38  ;;  %1017 = vmatmul.bf16.gmra.mxu0 %v3004_v40 }
 0x15a   :  { %2664 = vmatmul.msk.bf16.gmra.mxu2 %vm507_vm2, %v3175_v0  ;;  %2662 = vmatmul.msk.bf16.gmra.mxu3 %vm507_vm2, %v3117_v37  ;;  %v3457_v47 = vpop.permute.xlu2 %1744 }
 0x15b   :  { %v960_v57 = vpop.f32.mrf.mxu3 }
 0x15c   :  { %v961_v33 = vadd.f32 %v960_v57, %v887_v5 }
 0x15d   :  { %v776_v56 = vpop.f32.mrf.mxu2  ;;  %v889_v48 = vpop.f32.mrf.mxu1 }
 0x15e   :  { %v632_v59 = vpop.f32.mrf.mxu0  ;;  %2107 = vrot.lane.b32.xlu0 %v847_v44, %s2895_s21  ;;  %1680 = vrot.lane.b32.xlu2 %v961_v33, %s2896_s22  ;;  %v850_v58 = vadd.f32 %v3343_v39, %v776_v56 }
 0x15f   :  { %v706_v46 = vadd.f32 %v3346_v9, %v632_v59 }
 0x160   :  { %2138 = vrot.lane.b32.xlu1 %v704_v28, %s2897_s23 }
 0x163   :  { %v962_v4 = vpop.f32.mrf.mxu3 }
 0x164   :  { %v963_v17 = vadd.f32 %v962_v4, %v889_v48 }
 0x165   :  { %v778_v3 = vpop.f32.mrf.mxu2  ;;  %v892_v20 = vpop.f32.mrf.mxu1 }
 0x166   :  { %v635_v34 = vpop.f32.mrf.mxu0  ;;  %2171 = vrot.lane.b32.xlu0 %v706_v46, %s2898_s24  ;;  %2140 = vrot.lane.b32.xlu2 %v850_v58, %s2897_s23  ;;  %v852_v13 = vadd.f32 %v3351_v52, %v778_v3 }
 0x167   :  { %v709_v21 = vadd.f32 %v3354_v22, %v635_v34 }
 0x168   :  { %1713 = vrot.lane.b32.xlu1 %v963_v17, %s2899_s25 }
 0x169   :  { %1158 = vmatmul.bf16.vlgmr.msra.gmra.mxu1 %v2976_v32  ;;  %1022 = vmatmul.bf16.gmra.mxu0 %v3026_v49  ;;  %v3468_v32 = vpop.permute.xlu2 %1808 }
 0x16a   :  { %2665 = vmatmul.msk.bf16.gmra.mxu2 %vm507_vm2, %v3212_v23  ;;  %2676 = vmatmul.msk.bf16.vlgmr.msra.gmra.mxu3 %vm507_vm2, %v3144_v45 }
 0x16b   :  { %v965_v27 = vpop.f32.mrf.mxu3  ;;  %v3475_v52 = vpop.permute.xlu1 %1742 }
 0x16c   :  { %v966_v43 = vadd.f32 %v965_v27, %v892_v20  ;;  %v4108_v27 = vld [vmem:[#allocation15_spill] sm:$0xff] }
 0x16d   :  { %v781_v39 = vpop.f32.mrf.mxu2  ;;  %v894_v42 = vpop.f32.mrf.mxu1 }
 0x16e   :  { %v637_v9 = vpop.f32.mrf.mxu0  ;;  %1746 = vrot.lane.b32.xlu0 %v966_v43, %s2877_s0  ;;  %2204 = vrot.lane.b32.xlu2 %v709_v21, %s2900_s26  ;;  %v855_v31 = vadd.f32 %v3366_v25, %v781_v39 }
 0x170   :  { %2173 = vrot.lane.b32.xlu1 %v852_v13, %s2898_s24 }
 0x172   :  { %v3479_v16 = vpop.permute.xlu2 %1843 }
 0x173   :  { %v967_v61 = vpop.f32.mrf.mxu3 }
 0x174   :  { %v968_v22 = vadd.f32 %v967_v61, %v894_v42 }
 0x175   :  { %v783_v45 = vpop.f32.mrf.mxu2  ;;  %v897_v11 = vpop.f32.mrf.mxu1 }
 0x176   :  { %v3470_v14 = vpop.f32.mrf.mxu0  ;;  %2206 = vrot.lane.b32.xlu0 %v855_v31, %s2900_s26  ;;  %1779 = vrot.lane.b32.xlu2 %v968_v22, %s2878_s5  ;;  %v4110_v45 = vld [vmem:[#allocation9_spill] sm:$0xff]  ;;  %v4111_v22 = vld [vmem:[#allocation11_spill] sm:$0xff] }
 0x179   :  { %1163 = vmatmul.bf16.gmra.mxu1 %v3004_v40  ;;  %1027 = vmatmul.bf16.gmra.mxu0 %v3048_v62  ;;  %v3492_v40 = vpop.permute.xlu0 %1428 }
 0x17a   :  { %2666 = vmatmul.msk.bf16.gmra.mxu2 %vm507_vm2, %v3249_v54  ;;  %2677 = vmatmul.msk.bf16.gmra.mxu3 %vm507_vm2, %v3175_v0  ;;  %v3490_v5 = vpop.permute.xlu1 %1777 }
 0x17b   :  { %v970_v51 = vpop.f32.mrf.mxu3  ;;  %v3494_v29 = vpop.permute.xlu2 %1907 }
 0x17c   :  { %v971_v26 = vadd.f32 %v970_v51, %v897_v11  ;;  %v4112_v51 = vld [vmem:[#allocation18_spill] sm:$0xff] }
 0x17d   :  { %v3485_v25 = vpop.f32.mrf.mxu2  ;;  %v899_v1 = vpop.f32.mrf.mxu1 }
 0x17e   :  { %v650_v10 = vpop.f32.mrf.mxu0  ;;  %1812 = vrot.lane.b32.xlu1 %v971_v26, %s2879_s6 }
 0x17f   :  { %v651_v53 = vadd.f32 %v650_v10, %v3184_v2 }
 0x181   :  { %1445 = vrot.lane.b32.xlu0 %v651_v53, %s2883_s10  ;;  %v3503_v48 = vpop.permute.xlu0 %1775 }
 0x183   :  { %v972_v59 = vpop.f32.mrf.mxu3  ;;  %v3499_v2 = vpop.permute.xlu1 %1841 }
 0x184   :  { %v973_v44 = vadd.f32 %v972_v59, %v899_v1 }
 0x185   :  { %v796_v0 = vpop.f32.mrf.mxu2  ;;  %v902_v33 = vpop.f32.mrf.mxu1 }
 0x186   :  { %v797_v56 = vadd.f32 %v796_v0, %v3204_v15  ;;  %v653_v57 = vpop.f32.mrf.mxu0  ;;  %v4113_v0 = vld [vmem:[#allocation17_spill] sm:$0xff] }
 0x187   :  { %v654_v17 = vadd.f32 %v653_v57, %v3206_v19  ;;  %v4109_v19 = vld [vmem:[#allocation16_spill] sm:$0xff] }
 0x188   :  { %1447 = vrot.lane.b32.xlu1 %v797_v56, %s2883_s10  ;;  %v3508_v15 = vpop.permute.xlu2 %1482 }
 0x189   :  { %1845 = vrot.lane.b32.xlu0 %v973_v44, %s2880_s7  ;;  %1168 = vmatmul.bf16.gmra.mxu1 %v3026_v49 }
 0x18a   :  { %2667 = vmatmul.msk.bf16.gmra.mxu2 %vm507_vm2, %v3286_v6  ;;  %2678 = vmatmul.msk.bf16.gmra.mxu3 %vm507_vm2, %v3212_v23  ;;  %v3518_v23 = vpop.permute.xlu0 %1810 }
 0x18b   :  { %1032 = vmatmul.bf16.gmra.mxu0 %v3070_v7 }
 0x18d   :  { %v799_v28 = vpop.f32.mrf.mxu2  ;;  %v975_v34 = vpop.f32.mrf.mxu3 }
 0x18e   :  { %v800_v3 = vadd.f32 %v799_v28, %v3219_v24  ;;  %v655_v4 = vpop.f32.mrf.mxu0  ;;  %v976_v58 = vadd.f32 %v975_v34, %v902_v33  ;;  %v904_v46 = vpop.f32.mrf.mxu1  ;;  %v4114_v33 = vld [vmem:[#allocation20_spill] sm:$0xff] }
 0x18f   :  { %v656_v21 = vadd.f32 %v655_v4, %v4108_v27 }
 0x190   :  { %1878 = vrot.lane.b32.xlu2 %v976_v58, %s2881_s8  ;;  %1480 = vrot.lane.b32.xlu1 %v800_v3, %s2885_s12  ;;  %v3520_v20 = vpop.permute.xlu2 %1942 }
 0x191   :  { %1478 = vrot.lane.b32.xlu0 %v654_v17, %s2885_s12  ;;  %v4116_v17 = vld [vmem:[#allocation19_spill] sm:$0xff] }
 0x192   :  { %v3515_v49 = vpop.permute.xlu1 %1876  ;;  %v3529_v61 = vpop.permute.xlu0 %1874 }
 0x195   :  { %v801_v39 = vpop.f32.mrf.mxu2  ;;  %v977_v24 = vpop.f32.mrf.mxu3 }
 0x196   :  { %v658_v9 = vpop.f32.mrf.mxu0  ;;  %v978_v43 = vadd.f32 %v977_v24, %v904_v46  ;;  %v907_v42 = vpop.f32.mrf.mxu1  ;;  %v802_v13 = vadd.f32 %v801_v39, %v4109_v19  ;;  %v4117_v24 = vld [vmem:[#allocation10_spill] sm:$0xff] }
 0x197   :  { %v659_v56 = vadd.f32 %v658_v9, %v4113_v0 }
 0x198   :  { %1911 = vrot.lane.b32.xlu1 %v978_v43, %s2882_s9  ;;  %1511 = vrot.lane.b32.xlu2 %v656_v21, %s2887_s14  ;;  %v3537_v11 = vpop.permute.xlu2 %2006  ;;  %v4119_v21 = vld [vmem:[#allocation12_spill] sm:$0xff] }
 0x199   :  { %1513 = vrot.lane.b32.xlu0 %v802_v13, %s2887_s14  ;;  %1173 = vmatmul.bf16.gmra.mxu1 %v3048_v62  ;;  %v4120_v13 = vld [vmem:[#allocation21_spill] sm:$0xff] }
 0x19a   :  { %2668 = vmatmul.msk.bf16.gmra.mxu2 %vm507_vm2, %v4110_v45  ;;  %2679 = vmatmul.msk.bf16.gmra.mxu3 %vm507_vm2, %v3249_v54  ;;  %v3534_v31 = vpop.permute.xlu1 %1449  ;;  %v3544_v62 = vpop.permute.xlu0 %1909 }
 0x19b   :  { %1037 = vmatmul.bf16.gmra.mxu0 %v4111_v22 }
 0x19d   :  { %v804_v10 = vpop.f32.mrf.mxu2  ;;  %v980_v26 = vpop.f32.mrf.mxu3 }
 0x19e   :  { %v805_v53 = vadd.f32 %v804_v10, %v4112_v51  ;;  %v660_v1 = vpop.f32.mrf.mxu0  ;;  %v909_v59 = vpop.f32.mrf.mxu1  ;;  %v981_v57 = vadd.f32 %v980_v26, %v907_v42  ;;  %v4121_v26 = vld [vmem:[#allocation22_spill] sm:$0xff] }
 0x19f   :  { %v661_v39 = vadd.f32 %v660_v1, %v4116_v17 }
 0x1a0   :  { %1544 = vrot.lane.b32.xlu1 %v659_v56, %s2888_s15  ;;  %1546 = vrot.lane.b32.xlu2 %v805_v53, %s2888_s15  ;;  %v3549_v4 = vpop.permute.xlu2 %1581 }
 0x1a1   :  { %1944 = vrot.lane.b32.xlu0 %v981_v57, %s2886_s13  ;;  %4115 = vst [vmem:[#allocation15_spill] sm:$0xff] %v3549_v4 }
 0x1a2   :  { %v3546_v54 = vpop.permute.xlu1 %1940 }
 0x1a3   :  { %v3557_v9 = vpop.permute.xlu0 %1973 }
 0x1a5   :  { %v806_v44 = vpop.f32.mrf.mxu2  ;;  %v982_v3 = vpop.f32.mrf.mxu3 }
 0x1a6   :  { %v807_v28 = vadd.f32 %v806_v44, %v4114_v33  ;;  %v663_v34 = vpop.f32.mrf.mxu0  ;;  %v983_v58 = vadd.f32 %v982_v3, %v909_v59  ;;  %v912_v46 = vpop.f32.mrf.mxu1  ;;  %v4122_v59 = vld [vmem:[#allocation24_spill] sm:$0xff]  ;;  %v4123_v33 = vld [vmem:[#allocation23_spill] sm:$0xff] }
 0x1a7   :  { %v664_v10 = vadd.f32 %v663_v34, %v4120_v13 }
 0x1a8   :  { %1579 = vrot.lane.b32.xlu1 %v807_v28, %s2890_s17  ;;  %1977 = vrot.lane.b32.xlu2 %v983_v58, %s2884_s11  ;;  %v3567_v0 = vpop.permute.xlu2 %2041 }
 0x1a9   :  { %1577 = vrot.lane.b32.xlu0 %v661_v39, %s2890_s17  ;;  %1178 = vmatmul.bf16.gmra.mxu1 %v3070_v7 }
 0x1aa   :  { %2669 = vmatmul.msk.bf16.gmra.mxu2 %vm507_vm2, %v4117_v24  ;;  %2680 = vmatmul.msk.bf16.gmra.mxu3 %vm507_vm2, %v3286_v6  ;;  %v3562_v27 = vpop.permute.xlu1 %1515 }
 0x1ab   :  { %4118 = vst [vmem:[#allocation16_spill] sm:$0xff] %v3562_v27  ;;  %1042 = vmatmul.bf16.gmra.mxu0 %v4119_v21 }
 0x1ad   :  { %v809_v43 = vpop.f32.mrf.mxu2  ;;  %v985_v42 = vpop.f32.mrf.mxu3 }
 0x1ae   :  { %v665_v19 = vpop.f32.mrf.mxu0  ;;  %v986_v51 = vadd.f32 %v985_v42, %v912_v46  ;;  %v914_v53 = vpop.f32.mrf.mxu1  ;;  %v810_v1 = vadd.f32 %v809_v43, %v4121_v26  ;;  %v4125_v42 = vld [vmem:[#allocation26_spill] sm:$0xff] }
 0x1af   :  { %v666_v28 = vadd.f32 %v665_v19, %v4123_v33 }
 0x1b0   :  { %2010 = vrot.lane.b32.xlu1 %v986_v51, %s2889_s16  ;;  %1610 = vrot.lane.b32.xlu2 %v664_v10, %s2893_s19  ;;  %v3572_v7 = vpop.permute.xlu0 %1548  ;;  %v3583_v46 = vpop.permute.xlu2 %2105  ;;  %v4126_v51 = vld [vmem:[#allocation25_spill] sm:$0xff] }
 0x1b1   :  { %1612 = vrot.lane.b32.xlu0 %v810_v1, %s2893_s19  ;;  %4124 = vst [vmem:[#allocation9_spill] sm:$0xff] %v3583_v46 }
 0x1b2   :  { %v3574_v6 = vpop.permute.xlu1 %1975 }
 0x1b5   :  { %v811_v56 = vpop.f32.mrf.mxu2  ;;  %v987_v44 = vpop.f32.mrf.mxu3 }
 0x1b6   :  { %v812_v57 = vadd.f32 %v811_v56, %v4122_v59  ;;  %v668_v3 = vpop.f32.mrf.mxu0  ;;  %v988_v34 = vadd.f32 %v987_v44, %v914_v53  ;;  %v917_v58 = vpop.f32.mrf.mxu1  ;;  %v4128_v44 = vld [vmem:[#allocation27_spill] sm:$0xff] }
 0x1b7   :  { %v669_v53 = vadd.f32 %v668_v3, %v4126_v51  ;;  %v4129_v3 = vld [vmem:[#allocation28_spill] sm:$0xff] }
 0x1b8   :  { %1643 = vrot.lane.b32.xlu1 %v666_v28, %s2894_s20  ;;  %1645 = vrot.lane.b32.xlu2 %v812_v57, %s2894_s20  ;;  %v3588_v17 = vpop.permute.xlu0 %2008  ;;  %v3602_v56 = vpop.permute.xlu2 %1680 }
 0x1b9   :  { %2043 = vrot.lane.b32.xlu0 %v988_v34, %s2891_s18  ;;  %1183 = vmatmul.bf16.gmra.mxu1 %v4111_v22 }
 0x1ba   :  { %2670 = vmatmul.msk.bf16.gmra.mxu2 %vm507_vm2, %v3006_v41  ;;  %2681 = vmatmul.msk.bf16.gmra.mxu3 %vm507_vm2, %v4110_v45  ;;  %v3590_v39 = vpop.permute.xlu1 %2039 }
 0x1bb   :  { %1047 = vmatmul.bf16.gmra.mxu0 %v3134_v36 }
 0x1bd   :  { %v814_v43 = vpop.f32.mrf.mxu2  ;;  %v990_v13 = vpop.f32.mrf.mxu3 }
 0x1be   :  { %v815_v19 = vadd.f32 %v814_v43, %v4125_v42  ;;  %v991_v10 = vadd.f32 %v990_v13, %v917_v58  ;;  %v919_v26 = vpop.f32.mrf.mxu1  ;;  %v670_v1 = vpop.f32.mrf.mxu0 }
 0x1bf   :  { %v671_v33 = vadd.f32 %v670_v1, %v4128_v44 }
 0x1c0   :  { %1678 = vrot.lane.b32.xlu1 %v815_v19, %s2896_s22  ;;  %2076 = vrot.lane.b32.xlu2 %v991_v10, %s2892_s1  ;;  %v3598_v45 = vpop.permute.xlu0 %2072 }
 0x1c1   :  { %1676 = vrot.lane.b32.xlu0 %v669_v53, %s2896_s22  ;;  %v3621_v53 = vpop.permute.xlu2 %2140 }
 0x1c2   :  { %v3600_v22 = vpop.permute.xlu1 %1614  ;;  %4130 = vst [vmem:[#allocation18_spill] sm:$0xff] %v3621_v53 }
 0x1c3   :  { %4127 = vst [vmem:[#allocation11_spill] sm:$0xff] %v3600_v22 }
 0x1c5   :  { %v816_v59 = vpop.f32.mrf.mxu2  ;;  %v992_v57 = vpop.f32.mrf.mxu3 }
 0x1c6   :  { %v993_v28 = vadd.f32 %v992_v57, %v919_v26  ;;  %v817_v34 = vadd.f32 %v816_v59, %v4129_v3  ;;  %v922_v58 = vpop.f32.mrf.mxu1  ;;  %v1013_v43 = vpop.f32.mrf.mxu0 }
 0x1c8   :  { %2109 = vrot.lane.b32.xlu1 %v993_v28, %s2895_s21  ;;  %1709 = vrot.lane.b32.xlu2 %v671_v33, %s2899_s25  ;;  %v3614_v42 = vpop.permute.xlu0 %1647 }
 0x1c9   :  { %1711 = vrot.lane.b32.xlu0 %v817_v34, %s2899_s25  ;;  %1188 = vmatmul.bf16.gmra.mxu1 %v4119_v21  ;;  %v3629_v3 = vpop.permute.xlu2 %2204 }
 0x1ca   :  { %2671 = vmatmul.msk.bf16.gmra.mxu2 %vm507_vm2, %v3028_v50  ;;  %2682 = vmatmul.msk.bf16.gmra.mxu3 %vm507_vm2, %v4117_v24  ;;  %v3617_v19 = vpop.permute.xlu1 %2074  ;;  %4132 = vst [vmem:[#allocation20_spill] sm:$0xff] %v3629_v3 }
 0x1cb   :  { %1052 = vmatmul.bf16.gmra.mxu0 %v3161_v55 }
 0x1cd   :  { %v1086_v13 = vpop.f32.mrf.mxu2  ;;  %v995_v10 = vpop.f32.mrf.mxu3 }
 0x1ce   :  { %v3619_v51 = vadd.f32 %v1086_v13, %v1013_v43  ;;  %v996_v26 = vadd.f32 %v995_v10, %v922_v58  ;;  %v924_v1 = vpop.f32.mrf.mxu1  ;;  %v1015_v59 = vpop.f32.mrf.mxu0 }
 0x1d0   :  { %v3624_v21 = vpop.permute.xlu0 %2107 }
 0x1d1   :  { %2142 = vrot.lane.b32.xlu0 %v996_v26, %s2897_s23  ;;  %v3645_v3 = vpop.permute.xlu2 %1779 }
 0x1d2   :  { %v3626_v33 = vpop.permute.xlu1 %2138  ;;  %4135 = vst [vmem:[#allocation12_spill] sm:$0xff] %v3645_v3 }
 0x1d3   :  { %4131 = vst [vmem:[#allocation17_spill] sm:$0xff] %v3626_v33 }
 0x1d5   :  { %v1088_v24 = vpop.f32.mrf.mxu2  ;;  %v997_v57 = vpop.f32.mrf.mxu3 }
 0x1d6   :  { %v1089_v44 = vadd.f32 %v1088_v24, %v1015_v59  ;;  %v927_v28 = vpop.f32.mrf.mxu1  ;;  %v1018_v34 = vpop.f32.mrf.mxu0  ;;  %v998_v13 = vadd.f32 %v997_v57, %v924_v1 }
 0x1d8   :  { %1451 = vrot.lane.b32.xlu2 %v1089_v44, %s2883_s10  ;;  %v3636_v58 = vpop.permute.xlu0 %2171 }
 0x1d9   :  { %1193 = vmatmul.bf16.gmra.mxu1 %v3134_v36  ;;  %4133 = vst [vmem:[#allocation19_spill] sm:$0xff] %v3636_v58 }
 0x1da   :  { %2672 = vmatmul.msk.bf16.gmra.mxu2 %vm507_vm2, %v3050_v63  ;;  %2683 = vmatmul.msk.bf16.gmra.mxu3 %vm507_vm2, %v3006_v41  ;;  %v3643_v44 = vpop.permute.xlu1 %1713 }
 0x1db   :  { %1057 = vmatmul.bf16.gmra.mxu0 %v3196_v12 }
 0x1dd   :  { %v1091_v43 = vpop.f32.mrf.mxu2  ;;  %v1000_v10 = vpop.f32.mrf.mxu3 }
 0x1de   :  { %v1092_v26 = vadd.f32 %v1091_v43, %v1018_v34  ;;  %v3639_v59 = vadd.f32 %v1000_v10, %v927_v28  ;;  %v929_v24 = vpop.f32.mrf.mxu1  ;;  %v1020_v36 = vpop.f32.mrf.mxu0 }
 0x1e0   :  { %4134 = vst [vmem:[#allocation10_spill] sm:$0xff] %v3639_v59  ;;  %2175 = vrot.lane.b32.xlu2 %v998_v13, %s2898_s24  ;;  %1484 = vrot.lane.b32.xlu0 %v1092_v26, %s2885_s12  ;;  %v3647_v41 = vpop.permute.xlu0 %1746 }
 0x1e1   :  { %4136 = vst [vmem:[#allocation21_spill] sm:$0xff] %v3647_v41 }
 0x1e2   :  { %v3652_v28 = vpop.permute.xlu1 %2173 }
 0x1e3   :  { %4137 = vst [vmem:[#allocation22_spill] sm:$0xff] %v3652_v28 }
 0x1e5   :  { %v1093_v58 = vpop.f32.mrf.mxu2  ;;  %v1002_v33 = vpop.f32.mrf.mxu3 }
 0x1e6   :  { %v1094_v53 = vadd.f32 %v1093_v58, %v1020_v36  ;;  %v1159_v1 = vpop.f32.mrf.mxu1  ;;  %v1023_v57 = vpop.f32.mrf.mxu0 }
 0x1e8   :  { %1517 = vrot.lane.b32.xlu2 %v1094_v53, %s2887_s14  ;;  %v3659_v43 = vpop.permute.xlu0 %2206 }
 0x1e9   :  { %1198 = vmatmul.bf16.gmra.mxu1 %v3161_v55  ;;  %4139 = vst [vmem:[#allocation23_spill] sm:$0xff] %v3659_v43 }
 0x1ea   :  { %2673 = vmatmul.msk.bf16.gmra.mxu2 %vm507_vm2, %v3072_v8  ;;  %2684 = vmatmul.msk.bf16.gmra.mxu3 %vm507_vm2, %v3028_v50  ;;  %v3657_v34 = vpop.permute.xlu2 %1878 }
 0x1eb   :  { %4138 = vst [vmem:[#allocation24_spill] sm:$0xff] %v3657_v34  ;;  %1062 = vmatmul.bf16.gmra.mxu0 %v3233_v35  ;;  %v4141_v34 = vld [vmem:[#allocation14_spill] sm:$0xff] }
 0x1ec   :  { %v795_v3 = vadd.f32 %v3485_v25, %v4141_v34 }
 0x1ed   :  { %v1096_v33 = vpop.f32.mrf.mxu2  ;;  %v1232_v53 = vpop.f32.mrf.mxu3 }
 0x1ee   :  { %v1097_v58 = vadd.f32 %v1096_v33, %v1023_v57  ;;  %v1161_v13 = vpop.f32.mrf.mxu1  ;;  %v1025_v10 = vpop.f32.mrf.mxu0  ;;  %v1432_v33 = vadd.f32 %v3492_v40, %v795_v3 }
 0x1f0   :  { %1550 = vrot.lane.b32.xlu1 %v1097_v58, %s2888_s15  ;;  %v3663_v26 = vpop.permute.xlu1 %1812 }
 0x1f1   :  { %4140 = vst [vmem:[#allocation26_spill] sm:$0xff] %v3663_v26 }
 0x1f2   :  { %v3665_v24 = vpop.permute.xlu2 %1511 }
 0x1f3   :  { %v3667_v55 = vpop.permute.xlu0 %1445 }
 0x1f5   :  { %v1098_v50 = vpop.f32.mrf.mxu2  ;;  %v1234_v1 = vpop.f32.mrf.mxu3 }
 0x1f6   :  { %v1099_v36 = vadd.f32 %v1098_v50, %v1025_v10  ;;  %v1235_v41 = vadd.f32 %v1234_v1, %v1161_v13  ;;  %v1164_v59 = vpop.f32.mrf.mxu1  ;;  %v1028_v57 = vpop.f32.mrf.mxu0 }
 0x1f8   :  { %1583 = vrot.lane.b32.xlu0 %v1099_v36, %s2890_s17  ;;  %1453 = vrot.lane.b32.xlu2 %v1235_v41, %s2883_s10 }
 0x1f9   :  { %1203 = vmatmul.bf16.gmra.mxu1 %v3196_v12 }
 0x1fa   :  { %2674 = vmatmul.msk.bf16.gmra.mxu2 %vm507_vm2, %v3094_v18  ;;  %2685 = vmatmul.msk.bf16.gmra.mxu3 %vm507_vm2, %v3050_v63  ;;  %v3679_v58 = vpop.permute.xlu1 %1447  ;;  %v3681_v25 = vpop.permute.xlu2 %1546 }
 0x1fb   :  { %v1457_v41 = vsel %vm1455_vm3, %v3679_v58, %v3534_v31  ;;  %v3686_v34 = vpop.permute.xlu0 %1845  ;;  %1067 = vmatmul.bf16.gmra.mxu0 %v3270_v30 }
 0x1fc   :  { %4142 = vst [vmem:[#allocation25_spill] sm:$0xff] %v3686_v34  ;;  %v1465_v53 = vadd.f32 %v1457_v41, %v1432_v33 }
 0x1fd   :  { %v1101_v13 = vpop.f32.mrf.mxu2  ;;  %v1237_v10 = vpop.f32.mrf.mxu3 }
 0x1fe   :  { %v1102_v3 = vadd.f32 %v1101_v13, %v1028_v57  ;;  %v1238_v12 = vadd.f32 %v1237_v10, %v1164_v59  ;;  %v1166_v50 = vpop.f32.mrf.mxu1  ;;  %v1030_v63 = vpop.f32.mrf.mxu0 }
 0x200   :  { %1486 = vrot.lane.b32.xlu1 %v1238_v12, %s2885_s12  ;;  %1616 = vrot.lane.b32.xlu2 %v1102_v3, %s2893_s19 }
 0x202   :  { %v3691_v36 = vpop.permute.xlu1 %1480  ;;  %v3693_v1 = vpop.permute.xlu2 %1977 }
 0x203   :  { %4143 = vst [vmem:[#allocation27_spill] sm:$0xff] %v3693_v1  ;;  %v1490_v34 = vsel %vm1488_vm4, %v3691_v36, %v3508_v15  ;;  %v3698_v33 = vpop.permute.xlu0 %1478 }
 0x204   :  { %v1498_v57 = vadd.f32 %v1490_v34, %v1465_v53 }
 0x205   :  { %v1103_v41 = vpop.f32.mrf.mxu2  ;;  %v1239_v13 = vpop.f32.mrf.mxu3 }
 0x206   :  { %v1104_v59 = vadd.f32 %v1103_v41, %v1030_v63  ;;  %v1240_v10 = vadd.f32 %v1239_v13, %v1166_v50  ;;  %v1169_v12 = vpop.f32.mrf.mxu1 }
 0x208   :  { %1649 = vrot.lane.b32.xlu1 %v1104_v59, %s2894_s20  ;;  %1519 = vrot.lane.b32.xlu0 %v1240_v10, %s2887_s14  ;;  %v1033_v3 = vpop.f32.mrf.mxu0 }
 0x209   :  { %1208 = vmatmul.bf16.gmra.mxu1 %v3233_v35 }
 0x20a   :  { %2675 = vmatmul.msk.bf16.gmra.mxu2 %vm507_vm2, %v3117_v37  ;;  %2686 = vmatmul.msk.bf16.gmra.mxu3 %vm507_vm2, %v3072_v8  ;;  %v3707_v34 = vpop.permute.xlu1 %1911  ;;  %v3709_v53 = vpop.permute.xlu2 %1610  ;;  %v1556_v8 = vsel %vm1554_vm6, %v3681_v25, %v3572_v7 }
 0x20b   :  { %4144 = vst [vmem:[#allocation28_spill] sm:$0xff] %v3707_v34  ;;  %v3711_v50 = vpop.permute.xlu0 %1513  ;;  %1072 = vmatmul.bf16.gmra.mxu0 %v3302_v38 }
 0x20c   :  { %v1523_v63 = vsel %vm1521_vm5, %v3711_v50, %v3562_v27 }
 0x20d   :  { %v1106_v41 = vpop.f32.mrf.mxu2  ;;  %v1531_v59 = vadd.f32 %v1523_v63, %v1498_v57  ;;  %v1242_v35 = vpop.f32.mrf.mxu3 }
 0x20e   :  { %v1107_v13 = vadd.f32 %v1106_v41, %v1033_v3  ;;  %v1243_v10 = vadd.f32 %v1242_v35, %v1169_v12  ;;  %v1171_v1 = vpop.f32.mrf.mxu1 }
 0x20f   :  { %v1564_v34 = vadd.f32 %v1556_v8, %v1531_v59 }
 0x210   :  { %1552 = vrot.lane.b32.xlu2 %v1243_v10, %s2888_s15  ;;  %1682 = vrot.lane.b32.xlu0 %v1107_v13, %s2896_s22  ;;  %v1035_v26 = vpop.f32.mrf.mxu0 }
 0x212   :  { %v1545_v43 = vpop.permute.xlu1 %1544  ;;  %v3724_v46 = vpop.permute.xlu2 %1645 }
 0x213   :  { %v3722_v28 = vpop.permute.xlu0 %1944 }
 0x214   :  { %4145 = vst [vmem:[#allocation14_spill] sm:$0xff] %v3722_v28 }
 0x215   :  { %v1108_v27 = vpop.f32.mrf.mxu2  ;;  %v1244_v3 = vpop.f32.mrf.mxu3 }
 0x216   :  { %v1109_v57 = vadd.f32 %v1108_v27, %v1035_v26  ;;  %v1245_v63 = vadd.f32 %v1244_v3, %v1171_v1  ;;  %v1174_v41 = vpop.f32.mrf.mxu1 }
 0x218   :  { %1585 = vrot.lane.b32.xlu1 %v1245_v63, %s2890_s17  ;;  %1715 = vrot.lane.b32.xlu2 %v1109_v57, %s2899_s25  ;;  %v1038_v12 = vpop.f32.mrf.mxu0 }
 0x219   :  { %1213 = vmatmul.bf16.gmra.mxu1 %v3270_v30 }
 0x21a   :  { %2687 = vmatmul.msk.bf16.gmra.mxu3 %vm507_vm2, %v3094_v18  ;;  %v1580_v59 = vpop.permute.xlu1 %1579  ;;  %v3733_v3 = vpop.permute.xlu2 %2076 }
 0x21b   :  { %v1589_v13 = vsel %vm1587_vm7, %v1580_v59, %v3549_v4  ;;  %v1578_v35 = vpop.permute.xlu0 %1577  ;;  %4146 = vst [vmem:[#allocation29_spill] sm:$0xff] %v3733_v3  ;;  %v4148_v3 = vld [vmem:[#allocation13_spill] sm:$0xff] }
 0x21c   :  { %v1597_v27 = vadd.f32 %v1589_v13, %v1564_v34 }
 0x21d   :  { %v1111_v26 = vpop.f32.mrf.mxu2  ;;  %v1247_v8 = vpop.f32.mrf.mxu3 }
 0x21e   :  { %v1112_v1 = vadd.f32 %v1111_v26, %v1038_v12  ;;  %v1248_v10 = vadd.f32 %v1247_v8, %v1174_v41  ;;  %v1176_v57 = vpop.f32.mrf.mxu1  ;;  %v1655_v8 = vsel %vm1653_vm9, %v3724_v46, %v3614_v42 }
 0x220   :  { %1748 = vrot.lane.b32.xlu1 %v1112_v1, %s2877_s0  ;;  %1618 = vrot.lane.b32.xlu0 %v1248_v10, %s2893_s19  ;;  %v1040_v30 = vpop.f32.mrf.mxu0  ;;  %v649_v10 = vadd.f32 %v3470_v14, %v4148_v3 }
 0x222   :  { %v3737_v18 = vpop.permute.xlu1 %2010  ;;  %v1431_v14 = vadd.f32 %v3492_v40, %v649_v10 }
 0x223   :  { %4147 = vst [vmem:[#allocation30_spill] sm:$0xff] %v3737_v18  ;;  %v1613_v63 = vpop.permute.xlu0 %1612 }
 0x224   :  { %v1622_v34 = vsel %vm1620_vm8, %v1613_v63, %v3600_v22  ;;  %v1710_v22 = vpop.permute.xlu2 %1709 }
 0x225   :  { %v1113_v13 = vpop.f32.mrf.mxu2  ;;  %v1630_v12 = vadd.f32 %v1622_v34, %v1597_v27  ;;  %v1249_v41 = vpop.f32.mrf.mxu3  ;;  %v1456_v27 = vsel %vm1455_vm3, %v3667_v55, %v3679_v58 }
 0x226   :  { %v1114_v26 = vadd.f32 %v1113_v13, %v1040_v30  ;;  %v1250_v1 = vadd.f32 %v1249_v41, %v1176_v57  ;;  %v1179_v28 = vpop.f32.mrf.mxu1  ;;  %v1489_v30 = vsel %vm1488_vm4, %v3698_v33, %v3691_v36  ;;  %v1464_v13 = vadd.f32 %v1456_v27, %v1431_v14 }
 0x227   :  { %v1663_v4 = vadd.f32 %v1655_v8, %v1630_v12  ;;  %v1555_v41 = vsel %vm1554_vm6, %v1545_v43, %v3681_v25  ;;  %v1621_v27 = vsel %vm1620_vm8, %v3709_v53, %v1613_v63 }
 0x228   :  { %1651 = vrot.lane.b32.xlu2 %v1250_v1, %s2894_s20  ;;  %1781 = vrot.lane.b32.xlu0 %v1114_v26, %s2878_s5  ;;  %v1043_v18 = vpop.f32.mrf.mxu0  ;;  %v1497_v58 = vadd.f32 %v1489_v30, %v1464_v13 }
 0x229   :  { %1218 = vmatmul.bf16.gmra.mxu1 %v3302_v38  ;;  %v1522_v38 = vsel %vm1521_vm5, %v3665_v24, %v3711_v50  ;;  %v1588_v24 = vsel %vm1587_vm7, %v1578_v35, %v1580_v59 }
 0x22a   :  { %2688 = vmatmul.msk.bf16.gmra.mxu3 %vm507_vm2, %v3117_v37  ;;  %v1644_v57 = vpop.permute.xlu1 %1643  ;;  %v1530_v33 = vadd.f32 %v1522_v38, %v1497_v58  ;;  %vm1950_vm2 = vcmask 449536  }
 0x22b   :  { %v3755_v3 = vpop.permute.xlu0 %2043  ;;  %v1654_v35 = vsel %vm1653_vm9, %v1644_v57, %v3724_v46 }
 0x22c   :  { %v1563_v43 = vadd.f32 %v1555_v41, %v1530_v33  ;;  %v1753_v33 = vsel %vm1752_vm12, %v3475_v52, %v3457_v47  ;;  %v1819_v52 = vsel %vm4080_vm14, %v3468_v32, %v3518_v23  ;;  %v1918_v32 = vsel %vm4079_vm1, %v3494_v29, %v3544_v62 }
 0x22d   :  { %v1116_v34 = vpop.f32.mrf.mxu2  ;;  %v1252_v26 = vpop.f32.mrf.mxu3  ;;  %vm4082_vm1 = vcmask 424960   ;;  %vm4083_vm14 = vcmask 261120  }
 0x22e   :  { %v1117_v12 = vadd.f32 %v1116_v34, %v1043_v18  ;;  %v1253_v55 = vadd.f32 %v1252_v26, %v1179_v28  ;;  %v1181_v37 = vpop.f32.mrf.mxu1  ;;  %v1433_v18 = vadd.f32 %v3492_v40, %v3384_v60  ;;  %v1596_v30 = vadd.f32 %v1588_v24, %v1563_v43 }
 0x230   :  { %1684 = vrot.lane.b32.xlu1 %v1253_v55, %s2896_s22  ;;  %1814 = vrot.lane.b32.xlu2 %v1117_v12, %s2879_s6  ;;  %v1045_v36 = vpop.f32.mrf.mxu0 }
 0x232   :  { %v3769_v8 = vpop.permute.xlu2 %1451  ;;  %v1679_v28 = vpop.permute.xlu1 %1678 }
 0x233   :  { %v1458_v50 = vsel %vm1455_vm3, %v3534_v31, %v3769_v8  ;;  %v1688_v25 = vsel %vm1686_vm10, %v1679_v28, %v3602_v56  ;;  %v1677_v10 = vpop.permute.xlu0 %1676  ;;  %v1629_v31 = vadd.f32 %v1621_v27, %v1596_v30  ;;  %v1852_v27 = vsel %vm4077_vm15, %v3499_v2, %v3479_v16 }
 0x234   :  { %v3777_v1 = vadd.f32 %v1458_v50, %v1433_v18  ;;  %v1696_v60 = vadd.f32 %v1688_v25, %v1663_v4  ;;  %v1687_v26 = vsel %vm1686_vm10, %v1677_v10, %v1679_v28  ;;  %vm4081_vm15 = vcmask 441344  }
 0x235   :  { %v1118_v14 = vpop.f32.mrf.mxu2  ;;  %v1254_v59 = vpop.f32.mrf.mxu3  ;;  %v1662_v55 = vadd.f32 %v1654_v35, %v1629_v31  ;;  %v1984_v29 = vsel %vm4081_vm15, %v3557_v9, %v3574_v6  ;;  %vm4087_vm15 = vcmask 252928  }
 0x236   :  { %v1119_v34 = vadd.f32 %v1118_v14, %v1045_v36  ;;  %v1255_v13 = vadd.f32 %v1254_v59, %v1181_v37  ;;  %v1184_v12 = vpop.f32.mrf.mxu1 }
 0x237   :  { %v1695_v4 = vadd.f32 %v1687_v26, %v1662_v55 }
 0x238   :  { %1847 = vrot.lane.b32.xlu1 %v1119_v34, %s2880_s7  ;;  %1717 = vrot.lane.b32.xlu0 %v1255_v13, %s2899_s25  ;;  %v1048_v38 = vpop.f32.mrf.mxu0  ;;  %v1885_v34 = vsel %vm4078_vm0, %v3529_v61, %v3515_v49  ;;  %v1951_v61 = vsel %vm1950_vm2, %v3546_v54, %v3520_v20  ;;  %vm2016_vm0 = vcmask 433152  }
 0x23a   :  { %v3797_v50 = vpop.permute.xlu2 %2175 }
 0x23b   :  { %v1712_v53 = vpop.permute.xlu0 %1711 }
 0x23c   :  { %v1720_v63 = vsel %vm1719_vm11, %v1710_v22, %v1712_v53  ;;  %v1721_v46 = vsel %vm1719_vm11, %v1712_v53, %v3643_v44  ;;  %v1786_v22 = vsel %vm1785_vm13, %v3503_v48, %v3490_v5 }
 0x23d   :  { %v1121_v57 = vpop.f32.mrf.mxu2  ;;  %v1728_v58 = vadd.f32 %v1720_v63, %v1695_v4  ;;  %v3789_v37 = vadd.f32 %v1721_v46, %v1696_v60  ;;  %v1257_v36 = vpop.f32.mrf.mxu3  ;;  %v2017_v46 = vsel %vm2016_vm0, %v3537_v11, %v3588_v17  ;;  %v2083_v11 = vsel %vm4083_vm14, %v3598_v45, %v3617_v19  ;;  %v4150_v45 = vld [vmem:[#allocation16_spill] sm:$0xff] }
 0x23e   :  { %v1122_v41 = vadd.f32 %v1121_v57, %v1048_v38  ;;  %v1258_v18 = vadd.f32 %v1257_v36, %v1184_v12  ;;  %v1186_v28 = vpop.f32.mrf.mxu1  ;;  %vm4085_vm14 = vcmask 236544  }
 0x23f   :  { %v1761_v24 = vadd.f32 %v1753_v33, %v1728_v58 }
 0x240   :  { %1750 = vrot.lane.b32.xlu2 %v1258_v18, %s2877_s0  ;;  %1880 = vrot.lane.b32.xlu0 %v1122_v41, %s2881_s8  ;;  %v1050_v43 = vpop.f32.mrf.mxu0  ;;  %v2050_v41 = vsel %vm4082_vm1, %v3590_v39, %v3567_v0  ;;  %v1434_v18 = vadd.f32 %v3492_v40, %v3619_v51  ;;  %vm4086_vm1 = vcmask 244736  }
 0x241   :  { %v1794_v25 = vadd.f32 %v1786_v22, %v1761_v24 }
 0x242   :  { %v3820_v26 = vpop.permute.xlu2 %1517 }
 0x243   :  { %v1827_v10 = vadd.f32 %v1819_v52, %v1794_v25  ;;  %v3815_v12 = vpop.permute.xlu0 %2142  ;;  %v4149_v25 = vld [vmem:[#allocation9_spill] sm:$0xff]  ;;  %v1524_v40 = vsel %vm1521_vm5, %v4150_v45, %v3820_v26 }
 0x244   :  { %v2116_v52 = vsel %vm4087_vm15, %v4149_v25, %v3624_v21 }
 0x245   :  { %v1123_v48 = vpop.f32.mrf.mxu2  ;;  %v1860_v60 = vadd.f32 %v1852_v27, %v1827_v10  ;;  %v1259_v30 = vpop.f32.mrf.mxu3 }
 0x246   :  { %v1124_v14 = vadd.f32 %v1123_v48, %v1050_v43  ;;  %v1260_v59 = vadd.f32 %v1259_v30, %v1186_v28  ;;  %v1189_v13 = vpop.f32.mrf.mxu1 }
 0x247   :  { %v1893_v35 = vadd.f32 %v1885_v34, %v1860_v60 }
 0x248   :  { %1783 = vrot.lane.b32.xlu1 %v1260_v59, %s2878_s5  ;;  %1913 = vrot.lane.b32.xlu2 %v1124_v14, %s2882_s9  ;;  %v1053_v2 = vpop.f32.mrf.mxu0  ;;  %v4152_v14 = vld [vmem:[#allocation17_spill] sm:$0xff] }
 0x249   :  { %v1926_v31 = vadd.f32 %v1918_v32, %v1893_v35  ;;  %v4153_v35 = vld [vmem:[#allocation22_spill] sm:$0xff] }
 0x24b   :  { %v1959_v38 = vadd.f32 %v1951_v61, %v1926_v31  ;;  %v3862_v31 = vpop.permute.xlu1 %2109 }
 0x24d   :  { %v1126_v55 = vpop.f32.mrf.mxu2  ;;  %v1992_v4 = vadd.f32 %v1984_v29, %v1959_v38  ;;  %v1262_v63 = vpop.f32.mrf.mxu3  ;;  %v4155_v38 = vld [vmem:[#allocation23_spill] sm:$0xff]  ;;  %v4156_v29 = vld [vmem:[#allocation20_spill] sm:$0xff] }
 0x24e   :  { %v1127_v53 = vadd.f32 %v1126_v55, %v1053_v2  ;;  %v1263_v57 = vadd.f32 %v1262_v63, %v1189_v13  ;;  %v1191_v58 = vpop.f32.mrf.mxu1  ;;  %v4154_v13 = vld [vmem:[#allocation19_spill] sm:$0xff] }
 0x24f   :  { %v2025_v54 = vadd.f32 %v2017_v46, %v1992_v4  ;;  %v2182_v32 = vsel %vm4085_vm14, %v4154_v13, %v4153_v35 }
 0x250   :  { %1946 = vrot.lane.b32.xlu1 %v1127_v53, %s2886_s13  ;;  %1816 = vrot.lane.b32.xlu0 %v1263_v57, %s2879_s6  ;;  %v1055_v9 = vpop.f32.mrf.mxu0 }
 0x251   :  { %v2058_v36 = vadd.f32 %v2050_v41, %v2025_v54 }
 0x252   :  { %v3833_v33 = vpop.permute.xlu0 %1484  ;;  %v1454_v24 = vpop.permute.xlu2 %1453 }
 0x253   :  { %v1491_v39 = vsel %vm1488_vm4, %v3508_v15, %v3833_v33  ;;  %v1459_v28 = vsel %vm1455_vm3, %v3769_v8, %v1454_v24  ;;  %v2091_v43 = vadd.f32 %v2083_v11, %v2058_v36  ;;  %v4151_v8 = vld [vmem:[#allocation18_spill] sm:$0xff]  ;;  %vm4084_vm3 = vcmask 228352  }
 0x254   :  { %v1499_v22 = vadd.f32 %v1491_v39, %v3777_v1  ;;  %v3852_v51 = vadd.f32 %v1459_v28, %v1434_v18  ;;  %v2149_v1 = vsel %vm4086_vm1, %v4152_v14, %v4151_v8  ;;  %v2215_v55 = vsel %vm4084_vm3, %v4156_v29, %v4155_v38 }
 0x255   :  { %v1128_v10 = vpop.f32.mrf.mxu2  ;;  %v1264_v27 = vpop.f32.mrf.mxu3  ;;  %v2124_v60 = vadd.f32 %v2116_v52, %v2091_v43 }
 0x256   :  { %v1129_v15 = vadd.f32 %v1128_v10, %v1055_v9  ;;  %v1532_v48 = vadd.f32 %v1524_v40, %v1499_v22  ;;  %v1265_v30 = vadd.f32 %v1264_v27, %v1191_v58  ;;  %v1194_v34 = vpop.f32.mrf.mxu1  ;;  %v4158_v27 = vld [vmem:[#allocation11_spill] sm:$0xff] }
 0x257   :  { %v2157_v59 = vadd.f32 %v2149_v1, %v2124_v60 }
 0x258   :  { %1849 = vrot.lane.b32.xlu2 %v1265_v30, %s2880_s7  ;;  %1979 = vrot.lane.b32.xlu0 %v1129_v15, %s2884_s11  ;;  %v1058_v2 = vpop.f32.mrf.mxu0 }
 0x259   :  { %v2190_v61 = vadd.f32 %v2182_v32, %v2157_v59 }
 0x25a   :  { %v3879_v45 = vpop.permute.xlu2 %1616 }
 0x25b   :  { %v3867_v4 = vadd.f32 %v2215_v55, %v2190_v61 }
 0x25d   :  { %v1131_v53 = vpop.f32.mrf.mxu2  ;;  %v1267_v46 = vpop.f32.mrf.mxu3  ;;  %v2689_v57 = vmul.f32 -1.442695, %v3867_v4 }
 0x25e   :  { %v1132_v63 = vadd.f32 %v1131_v53, %v1058_v2  ;;  %v1268_v54 = vadd.f32 %v1267_v46, %v1194_v34  ;;  %v1196_v58 = vpop.f32.mrf.mxu1 }
 0x25f   :  { %2804 = vpow2.f32 %v2689_v57 }
 0x260   :  { %1882 = vrot.lane.b32.xlu1 %v1268_v54, %s2881_s8  ;;  %2012 = vrot.lane.b32.xlu2 %v1132_v63, %s2889_s16  ;;  %v1060_v41 = vpop.f32.mrf.mxu0 }
 0x262   :  { %v3872_v9 = vpop.permute.xlu1 %1550 }
 0x263   :  { %v1557_v36 = vsel %vm1554_vm6, %v3572_v7, %v3872_v9  ;;  %v4157_v7 = vld [vmem:[#allocation15_spill] sm:$0xff] }
 0x264   :  { %v1565_v11 = vadd.f32 %v1557_v36, %v1532_v48  ;;  %v1623_v48 = vsel %vm1620_vm8, %v4158_v27, %v3879_v45 }
 0x265   :  { %v1133_v18 = vpop.f32.mrf.mxu2  ;;  %v2805_v24 = vpop.eup %2804 }
 0x266   :  { %v1134_v39 = vadd.f32 %v1133_v18, %v1060_v41  ;;  %v1269_v28 = vpop.f32.mrf.mxu3  ;;  %v2239_v43 = vadd.f32 1.0, %v2805_v24  ;;  %v1199_v25 = vpop.f32.mrf.mxu1 }
 0x267   :  { %v1270_v22 = vadd.f32 %v1269_v28, %v1196_v58 }
 0x268   :  { %2045 = vrot.lane.b32.xlu1 %v1134_v39, %s2891_s18  ;;  %v1063_v52 = vpop.f32.mrf.mxu0  ;;  %2806 = vrcp.f32 %v2239_v43  ;;  %v2254_v55 = vand.u32 2147483648, %v2239_v43  ;;  %v2252_v46 = vand.u32 2147483647, %v2239_v43  ;;  %vm2248_vm14 = vweird.f32 %v2239_v43 }
 0x269   :  { %1915 = vrot.lane.b32.xlu0 %v1270_v22, %s2882_s9 }
 0x26a   :  { %v3881_v40 = vpop.permute.xlu0 %1583  ;;  %v2255_v18 = vor.u32 1.1754944e-38, %v2254_v55  ;;  %vm2253_vm15 = vcmp.eq.f32.partialorder %v2252_v46, 8.507059e+37  ;;  %v1553_v22 = vpop.permute.xlu2 %1552 }
 0x26b   :  { %v1590_v10 = vsel %vm1587_vm7, %v4157_v7, %v3881_v40 }
 0x26c   :  { %v1598_v15 = vadd.f32 %v1590_v10, %v1565_v11 }
 0x26d   :  { %v1136_v60 = vpop.f32.mrf.mxu2 }
 0x26e   :  { %v1137_v14 = vadd.f32 %v1136_v60, %v1063_v52  ;;  %v1272_v1 = vpop.f32.mrf.mxu3  ;;  %v1631_v30 = vadd.f32 %v1623_v48, %v1598_v15  ;;  %v2807_v34 = vpop.eup %2806  ;;  %v1558_v48 = vsel %vm1554_vm6, %v3872_v9, %v1553_v22  ;;  %vm4167_vm6 = vcmask 621568  }
 0x26f   :  { %v1273_v59 = vadd.f32 %v1272_v1, %v1199_v25  ;;  %v1201_v13 = vpop.f32.mrf.mxu1  ;;  %v2244_v32 = vmul.f32 %v2807_v34, %v2239_v43  ;;  %vm2249_vm3 = vweird.f32 %v2807_v34 }
 0x270   :  { %v1065_v2 = vpop.f32.mrf.mxu0  ;;  %vm2250_vm1 = vmor %vm2248_vm14, %vm2249_vm3  ;;  %vm4178_vm14 = vcmask 441344  }
 0x271   :  { %1948 = vrot.lane.b32.xlu2 %v1273_v59, %s2886_s13  ;;  %2078 = vrot.lane.b32.xlu0 %v1137_v14, %s2892_s1  ;;  %v2245_v61 = vsub.f32 1.0, %v2244_v32  ;;  %vm4182_vm3 = vmmov %vm4178_vm14 }
 0x272   :  { %v1487_v29 = vpop.permute.xlu1 %1486  ;;  %v3909_v9 = vpop.permute.xlu2 %1715 }
 0x273   :  { %v1492_v53 = vsel %vm1488_vm4, %v3833_v33, %v1487_v29  ;;  %v2246_v63 = vmul.f32 %v2807_v34, %v2245_v61  ;;  %vm4163_vm4 = vcmask 637952  }
 0x274   :  { %v1500_v57 = vadd.f32 %v1492_v53, %v3852_v51 }
 0x275   :  { %v1138_v54 = vpop.f32.mrf.mxu2  ;;  %v2247_v36 = vadd.f32 %v2807_v34, %v2246_v63 }
 0x276   :  { %v1139_v58 = vadd.f32 %v1138_v54, %v1065_v2  ;;  %v1274_v41 = vpop.f32.mrf.mxu3 }
 0x277   :  { %v1275_v11 = vadd.f32 %v1274_v41, %v1201_v13  ;;  %v1204_v24 = vpop.f32.mrf.mxu1  ;;  %v2251_v39 = vsel %vm2250_vm1, %v2807_v34, %v2247_v36 }
 0x278   :  { %v1068_v33 = vpop.f32.mrf.mxu0  ;;  %v2256_v28 = vsel %vm2253_vm15, %v2255_v18, %v2251_v39 }
 0x279   :  { %1981 = vrot.lane.b32.xlu1 %v1275_v11, %s2884_s11  ;;  %2111 = vrot.lane.b32.xlu2 %v1139_v58, %s2895_s21  ;;  %v2303_v51 = vmul.f32 %v2256_v28, %v3867_v4 }
 0x27a   :  { %v1650_v25 = vpop.permute.xlu1 %1649  ;;  %v1520_v52 = vpop.permute.xlu0 %1519 }
 0x27b   :  { %v1656_v43 = vsel %vm1653_vm9, %v3614_v42, %v1650_v25  ;;  %v1525_v7 = vsel %vm1521_vm5, %v3820_v26, %v1520_v52  ;;  %2307 = vst [vmem:[#allocation6] sm:$0xff] %v2303_v51  ;;  %vm4165_vm5 = vcmask 629760  }
 0x27c   :  { %v3901_v10 = vadd.f32 %v1656_v43, %v1631_v30  ;;  %v1533_v15 = vadd.f32 %v1525_v7, %v1500_v57 }
 0x27d   :  { %v1141_v27 = vpop.f32.mrf.mxu2 }
 0x27e   :  { %v1142_v60 = vadd.f32 %v1141_v27, %v1068_v33  ;;  %v1277_v14 = vpop.f32.mrf.mxu3  ;;  %v1566_v4 = vadd.f32 %v1558_v48, %v1533_v15 }
 0x27f   :  { %v1278_v1 = vadd.f32 %v1277_v14, %v1204_v24  ;;  %v1206_v34 = vpop.f32.mrf.mxu1 }
 0x280   :  { %v1070_v42 = vpop.f32.mrf.mxu0 }
 0x281   :  { %2144 = vrot.lane.b32.xlu1 %v1142_v60, %s2897_s23  ;;  %2014 = vrot.lane.b32.xlu0 %v1278_v1, %s2889_s16 }
 0x282   :  { %v3911_v2 = vpop.permute.xlu0 %1682  ;;  %v1652_v57 = vpop.permute.xlu2 %1651 }
 0x283   :  { %v1657_v36 = vsel %vm1653_vm9, %v1650_v25, %v1652_v57  ;;  %vm4172_vm9 = vmmov %vm4163_vm4 }
 0x285   :  { %v1143_v59 = vpop.f32.mrf.mxu2 }
 0x286   :  { %v1144_v26 = vadd.f32 %v1143_v59, %v1070_v42  ;;  %v1279_v13 = vpop.f32.mrf.mxu3 }
 0x287   :  { %v1280_v30 = vadd.f32 %v1279_v13, %v1206_v34  ;;  %v1209_v32 = vpop.f32.mrf.mxu1 }
 0x288   :  { %v1073_v33 = vpop.f32.mrf.mxu0 }
 0x289   :  { %2047 = vrot.lane.b32.xlu2 %v1280_v30, %s2891_s18  ;;  %2177 = vrot.lane.b32.xlu0 %v1144_v26, %s2898_s24 }
 0x28a   :  { %v1586_v61 = vpop.permute.xlu1 %1585  ;;  %v3921_v43 = vpop.permute.xlu2 %1814 }
 0x28b   :  { %v1591_v29 = vsel %vm1587_vm7, %v3881_v40, %v1586_v61  ;;  %vm4169_vm7 = vcmask 457728  }
 0x28c   :  { %v1599_v55 = vadd.f32 %v1591_v29, %v1566_v4  ;;  %vm4179_vm15 = vmmov %vm4169_vm7 }
 0x28d   :  { %v1146_v28 = vpop.f32.mrf.mxu2  ;;  %vm4181_vm1 = vmmov %vm4169_vm7 }
 0x28e   :  { %v1282_v53 = vpop.f32.mrf.mxu3  ;;  %v1147_v27 = vadd.f32 %v1146_v28, %v1073_v33  ;;  %v4161_v28 = vld [vmem:[#allocation12_spill] sm:$0xff] }
 0x28f   :  { %v1283_v63 = vadd.f32 %v1282_v53, %v1209_v32  ;;  %v1211_v46 = vpop.f32.mrf.mxu1 }
 0x290   :  { %v1075_v48 = vpop.f32.mrf.mxu0 }
 0x291   :  { %2080 = vrot.lane.b32.xlu1 %v1283_v63, %s2892_s1 }
 0x292   :  { %v1619_v54 = vpop.permute.xlu0 %1618  ;;  %v1749_v40 = vpop.permute.xlu1 %1748 }
 0x293   :  { %v1624_v58 = vsel %vm1620_vm8, %v3879_v45, %v1619_v54  ;;  %vm4170_vm8 = vmmov %vm4163_vm4 }
 0x294   :  { %v1632_v41 = vadd.f32 %v1624_v58, %v1599_v55  ;;  %v4159_v55 = vld [vmem:[#allocation10_spill] sm:$0xff] }
 0x295   :  { %v1148_v60 = vpop.f32.mrf.mxu2 }
 0x296   :  { %v1284_v11 = vpop.f32.mrf.mxu3  ;;  %v1665_v24 = vadd.f32 %v1657_v36, %v1632_v41 }
 0x297   :  { %v1285_v18 = vadd.f32 %v1284_v11, %v1211_v46  ;;  %v1214_v39 = vpop.f32.mrf.mxu1 }
 0x299   :  { %2113 = vrot.lane.b32.xlu0 %v1285_v18, %s2895_s21  ;;  %v4160_v18 = vld [vmem:[#allocation21_spill] sm:$0xff] }
 0x29a   :  { %v1782_v45 = vpop.permute.xlu0 %1781  ;;  %v1751_v34 = vpop.permute.xlu2 %1750 }
 0x29b   :  { %v1756_v13 = vsel %vm1752_vm12, %v1749_v40, %v1751_v34  ;;  %v1722_v34 = vsel %vm1719_vm11, %v3643_v44, %v3909_v9 }
 0x29e   :  { %v1287_v22 = vpop.f32.mrf.mxu3 }
 0x29f   :  { %v1288_v51 = vadd.f32 %v1287_v22, %v1214_v39  ;;  %v1216_v52 = vpop.f32.mrf.mxu1  ;;  %v1787_v22 = vsel %vm1785_vm13, %v3490_v5, %v4161_v28 }
 0x2a1   :  { %2146 = vrot.lane.b32.xlu2 %v1288_v51, %s2897_s23 }
 0x2a2   :  { %v1685_v7 = vpop.permute.xlu1 %1684  ;;  %v1914_v58 = vpop.permute.xlu2 %1913 }
 0x2a3   :  { %v1690_v25 = vsel %vm1686_vm10, %v3911_v2, %v1685_v7  ;;  %v4162_v7 = vld [vmem:[#allocation26_spill] sm:$0xff] }
 0x2a4   :  { %v1698_v15 = vadd.f32 %v1690_v25, %v1665_v24  ;;  %v1754_v24 = vsel %vm1752_vm12, %v3457_v47, %v4160_v18  ;;  %v1820_v25 = vsel %vm4163_vm4, %v3518_v23, %v4162_v7  ;;  %v1689_v47 = vsel %vm1686_vm10, %v3602_v56, %v3911_v2  ;;  %vm4173_vm10 = vmmov %vm4165_vm5 }
 0x2a5   :  { %v1762_v39 = vadd.f32 %v1754_v24, %v3789_v37  ;;  %v4164_v37 = vld [vmem:[#allocation25_spill] sm:$0xff]  ;;  %v1755_v56 = vsel %vm1752_vm12, %v4160_v18, %v1749_v40  ;;  %vm4175_vm12 = vmmov %vm4167_vm6 }
 0x2a6   :  { %v1289_v14 = vpop.f32.mrf.mxu3  ;;  %v1853_v60 = vsel %vm4165_vm5, %v3479_v16, %v4164_v37  ;;  %v1788_v16 = vsel %vm1785_vm13, %v4161_v28, %v1782_v45  ;;  %vm4183_vm4 = vmmov %vm4182_vm3 }
 0x2a7   :  { %v1290_v1 = vadd.f32 %v1289_v14, %v1216_v52  ;;  %v1219_v4 = vpop.f32.mrf.mxu1  ;;  %v1795_v51 = vadd.f32 %v1787_v22, %v1762_v39  ;;  %v1697_v14 = vadd.f32 %v1689_v47, %v3901_v10 }
 0x2a9   :  { %2179 = vrot.lane.b32.xlu1 %v1290_v1, %s2898_s24  ;;  %2210 = vrot.lane.b32.xlu2 %v1147_v27, %s2900_s26 }
 0x2aa   :  { %v1718_v42 = vpop.permute.xlu0 %1717  ;;  %v1848_v63 = vpop.permute.xlu1 %1847 }
 0x2ab   :  { %v1723_v59 = vsel %vm1719_vm11, %v3909_v9, %v1718_v42  ;;  %v1730_v42 = vadd.f32 %v1722_v34, %v1697_v14  ;;  %vm4174_vm11 = vmmov %vm4165_vm5  ;;  %vm4184_vm5 = vcmask 424960  }
 0x2ac   :  { %v1731_v26 = vadd.f32 %v1723_v59, %v1698_v15  ;;  %v1828_v15 = vadd.f32 %v1820_v25, %v1795_v51 }
 0x2ae   :  { %v1292_v30 = vpop.f32.mrf.mxu3  ;;  %v1764_v61 = vadd.f32 %v1756_v13, %v1731_v26  ;;  %v1861_v5 = vadd.f32 %v1853_v60, %v1828_v15  ;;  %v1763_v26 = vadd.f32 %v1755_v56, %v1730_v42 }
 0x2af   :  { %v1293_v32 = vadd.f32 %v1292_v30, %v1219_v4  ;;  %v1221_v29 = vpop.f32.mrf.mxu1  ;;  %v4166_v4 = vld [vmem:[#allocation24_spill] sm:$0xff] }
 0x2b0   :  { %v1886_v23 = vsel %vm4167_vm6, %v3515_v49, %v4166_v4  ;;  %v4168_v30 = vld [vmem:[#allocation28_spill] sm:$0xff] }
 0x2b1   :  { %2208 = vrot.lane.b32.xlu1 %v4159_v55, %s2900_s26  ;;  %2212 = vrot.lane.b32.xlu0 %v1293_v32, %s2900_s26  ;;  %v1894_v2 = vadd.f32 %v1886_v23, %v1861_v5  ;;  %v1919_v49 = vsel %vm4169_vm7, %v3544_v62, %v4168_v30  ;;  %v1796_v32 = vadd.f32 %v1788_v16, %v1763_v26  ;;  %vm4188_vm7 = vmmov %vm4184_vm5 }
 0x2b2   :  { %v1881_v46 = vpop.permute.xlu0 %1880  ;;  %v1850_v11 = vpop.permute.xlu2 %1849 }
 0x2b3   :  { %v1927_v9 = vadd.f32 %v1919_v49, %v1894_v2 }
 0x2b6   :  { %v1294_v53 = vpop.f32.mrf.mxu3 }
 0x2b7   :  { %v4171_v53 = vld [vmem:[#allocation14_spill] sm:$0xff] }
 0x2b8   :  { %v1952_v18 = vsel %vm1950_vm2, %v3520_v20, %v4171_v53  ;;  %v4177_v20 = vld [vmem:[#allocation27_spill] sm:$0xff] }
 0x2b9   :  { %v1960_v62 = vadd.f32 %v1952_v18, %v1927_v9  ;;  %v1985_v25 = vsel %vm4178_vm14, %v3574_v6, %v4177_v20 }
 0x2ba   :  { %v1784_v57 = vpop.permute.xlu1 %1783  ;;  %v3943_v27 = vpop.permute.xlu2 %2012 }
 0x2bb   :  { %v1789_v10 = vsel %vm1785_vm13, %v1782_v45, %v1784_v57  ;;  %v1821_v45 = vsel %vm4172_vm9, %v4162_v7, %v3921_v43  ;;  %v1854_v57 = vsel %vm4173_vm10, %v4164_v37, %v1848_v63  ;;  %vm4176_vm13 = vmmov %vm4167_vm6  ;;  %v1993_v7 = vadd.f32 %v1985_v25, %v1960_v62 }
 0x2bc   :  { %v1797_v40 = vadd.f32 %v1789_v10, %v1764_v61  ;;  %v1829_v24 = vadd.f32 %v1821_v45, %v1796_v32  ;;  %v1887_v61 = vsel %vm4175_vm12, %v4166_v4, %v1881_v46  ;;  %vm4187_vm6 = vmmov %vm4184_vm5 }
 0x2be   :  { %v1862_v28 = vadd.f32 %v1854_v57, %v1829_v24 }
 0x2c0   :  { %v1895_v15 = vadd.f32 %v1887_v61, %v1862_v28 }
 0x2c2   :  { %v1817_v54 = vpop.permute.xlu0 %1816  ;;  %v1947_v41 = vpop.permute.xlu1 %1946 }
 0x2c3   :  { %v1822_v44 = vsel %vm4170_vm8, %v3921_v43, %v1817_v54  ;;  %v1855_v54 = vsel %vm4174_vm11, %v1848_v63, %v1850_v11  ;;  %v4180_v63 = vld [vmem:[#allocation30_spill] sm:$0xff]  ;;  %vm4193_vm11 = vcmask 244736  }
 0x2c4   :  { %v1830_v29 = vadd.f32 %v1822_v44, %v1797_v40  ;;  %v2018_v11 = vsel %vm2016_vm0, %v3588_v17, %v4180_v63  ;;  %v2051_v17 = vsel %vm4184_vm5, %v3567_v0, %v3755_v3  ;;  %v2150_v62 = vsel %vm4193_vm11, %v4151_v8, %v3815_v12  ;;  %vm4196_vm14 = vmmov %vm4193_vm11 }
 0x2c5   :  { %v2026_v5 = vadd.f32 %v2018_v11, %v1993_v7 }
 0x2c6   :  { %v1863_v22 = vadd.f32 %v1855_v54, %v1830_v29 }
 0x2c7   :  { %v2059_v42 = vadd.f32 %v2051_v17, %v2026_v5 }
 0x2ca   :  { %v1980_v36 = vpop.permute.xlu0 %1979 }
 0x2cb   :  { %v1949_v59 = vpop.permute.xlu2 %1948  ;;  %v1986_v4 = vsel %vm4182_vm3, %v4177_v20, %v1980_v36 }
 0x2d2   :  { %v1883_v33 = vpop.permute.xlu1 %1882 }
 0x2d3   :  { %v1888_v39 = vsel %vm4176_vm13, %v1881_v46, %v1883_v33  ;;  %v2112_v51 = vpop.permute.xlu2 %2111  ;;  %v1920_v46 = vsel %vm4181_vm1, %v4168_v30, %v1914_v58  ;;  %v1953_v33 = vsel %vm1950_vm2, %v4171_v53, %v1947_v41  ;;  %vm4195_vm13 = vmmov %vm4193_vm11 }
 0x2d4   :  { %v1896_v47 = vadd.f32 %v1888_v39, %v1863_v22  ;;  %v1928_v14 = vadd.f32 %v1920_v46, %v1895_v15 }
 0x2d6   :  { %v1961_v34 = vadd.f32 %v1953_v33, %v1928_v14 }
 0x2d8   :  { %v1994_v16 = vadd.f32 %v1986_v4, %v1961_v34 }
 0x2da   :  { %v3948_v48 = vpop.permute.xlu1 %2045 }
 0x2db   :  { %v1916_v52 = vpop.permute.xlu0 %1915  ;;  %v2052_v0 = vsel %vm4187_vm6, %v3755_v3, %v3948_v48 }
 0x2dc   :  { %v1921_v43 = vsel %vm4179_vm15, %v1914_v58, %v1916_v52  ;;  %v1954_v52 = vsel %vm1950_vm2, %v1947_v41, %v1949_v59  ;;  %v4185_v59 = vld [vmem:[#allocation29_spill] sm:$0xff]  ;;  %vm4186_vm2 = vcmask 261120   ;;  %vm4197_vm15 = vcmask 236544  }
 0x2dd   :  { %v1929_v60 = vadd.f32 %v1921_v43, %v1896_v47  ;;  %v2084_v30 = vsel %vm4186_vm2, %v3617_v19, %v4185_v59  ;;  %vm4189_vm8 = vmmov %vm4186_vm2 }
 0x2de   :  { %vm4190_vm9 = vmmov %vm4186_vm2 }
 0x2df   :  { %v1962_v2 = vadd.f32 %v1954_v52, %v1929_v60  ;;  %vm4198_vm1 = vmmov %vm4197_vm15 }
 0x2e0   :  { %vm4199_vm3 = vmmov %vm4198_vm1 }
 0x2e1   :  { %v2183_v8 = vsel %vm4199_vm3, %v4153_v35, %v3797_v50 }
 0x2e3   :  { %v3954_v1 = vpop.permute.xlu0 %2078  ;;  %v2048_v56 = vpop.permute.xlu2 %2047 }
 0x2e4   :  { %v2053_v9 = vsel %vm4188_vm7, %v3948_v48, %v2048_v56  ;;  %v2085_v32 = vsel %vm4189_vm8, %v4185_v59, %v3954_v1 }
 0x2eb   :  { %v1982_v13 = vpop.permute.xlu1 %1981 }
 0x2ec   :  { %v1987_v23 = vsel %vm4183_vm4, %v1980_v36, %v1982_v13  ;;  %v2019_v36 = vsel %vm2016_vm0, %v4180_v63, %v3943_v27  ;;  %v2092_v13 = vadd.f32 %v2084_v30, %v2059_v42  ;;  %vm4200_vm4 = vcmask 228352  }
 0x2ed   :  { %v1995_v10 = vadd.f32 %v1987_v23, %v1962_v2  ;;  %v2027_v49 = vadd.f32 %v2019_v36, %v1994_v16  ;;  %vm4201_vm5 = vmmov %vm4200_vm4 }
 0x2ee   :  { %vm4202_vm2 = vmmov %vm4200_vm4 }
 0x2ef   :  { %v2060_v40 = vadd.f32 %v2052_v0, %v2027_v49 }
 0x2f1   :  { %v2093_v18 = vadd.f32 %v2085_v32, %v2060_v40 }
 0x2f3   :  { %v2015_v55 = vpop.permute.xlu0 %2014  ;;  %v2145_v37 = vpop.permute.xlu1 %2144 }
 0x2f4   :  { %v2020_v58 = vsel %vm2016_vm0, %v3943_v27, %v2015_v55  ;;  %vm4191_vm0 = vcmask 252928   ;;  %v2151_v24 = vsel %vm4195_vm13, %v3815_v12, %v2145_v37 }
 0x2f5   :  { %v2028_v41 = vadd.f32 %v2020_v58, %v1995_v10  ;;  %v2117_v3 = vsel %vm4191_vm0, %v3624_v21, %v3862_v31  ;;  %vm4192_vm10 = vmmov %vm4191_vm0 }
 0x2f6   :  { %v2125_v53 = vadd.f32 %v2117_v3, %v2092_v13  ;;  %vm4194_vm12 = vmmov %vm4191_vm0 }
 0x2f7   :  { %v2061_v27 = vadd.f32 %v2053_v9, %v2028_v41 }
 0x2f8   :  { %v2158_v54 = vadd.f32 %v2150_v62, %v2125_v53 }
 0x2fa   :  { %v2191_v12 = vadd.f32 %v2183_v8, %v2158_v54 }
 0x2fb   :  { %v2178_v6 = vpop.permute.xlu0 %2177  ;;  %v2147_v29 = vpop.permute.xlu2 %2146 }
 0x2fc   :  { %v2152_v21 = vsel %vm4196_vm14, %v2145_v37, %v2147_v29  ;;  %v2184_v39 = vsel %vm4197_vm15, %v3797_v50, %v2178_v6 }
 0x303   :  { %v2081_v26 = vpop.permute.xlu1 %2080  ;;  %v2211_v25 = vpop.permute.xlu2 %2210 }
 0x304   :  { %v2086_v19 = vsel %vm4190_vm9, %v3954_v1, %v2081_v26  ;;  %v2118_v1 = vsel %vm4194_vm12, %v3862_v31, %v2112_v51 }
 0x305   :  { %v2094_v45 = vadd.f32 %v2086_v19, %v2061_v27  ;;  %v2126_v61 = vadd.f32 %v2118_v1, %v2093_v18 }
 0x307   :  { %v2159_v22 = vadd.f32 %v2151_v24, %v2126_v61 }
 0x309   :  { %v2192_v31 = vadd.f32 %v2184_v39, %v2159_v22 }
 0x30b   :  { %v2114_v44 = vpop.permute.xlu0 %2113 }
 0x30c   :  { %v2119_v55 = vsel %vm4192_vm10, %v2112_v51, %v2114_v44 }
 0x30d   :  { %v2127_v57 = vadd.f32 %v2119_v55, %v2094_v45 }
 0x30f   :  { %v2160_v20 = vadd.f32 %v2152_v21, %v2127_v57 }
 0x31b   :  { %v2180_v48 = vpop.permute.xlu1 %2179 }
 0x31c   :  { %v2185_v28 = vsel %vm4198_vm1, %v2178_v6, %v2180_v48 }
 0x31d   :  { %v2193_v51 = vadd.f32 %v2185_v28, %v2160_v20 }
 0x323   :  { %v2209_v43 = vpop.permute.xlu1 %2208  ;;  %v2213_v7 = vpop.permute.xlu0 %2212 }
 0x324   :  { %v2216_v15 = vsel %vm4200_vm4, %v4155_v38, %v2209_v43  ;;  %v2217_v47 = vsel %vm4201_vm5, %v2209_v43, %v2211_v25  ;;  %v2218_v37 = vsel %vm4202_vm2, %v2211_v25, %v2213_v7 }
 0x325   :  { %v2224_v60 = vadd.f32 %v2216_v15, %v2191_v12  ;;  %v2225_v63 = vadd.f32 %v2217_v47, %v2192_v31  ;;  %v4042_v11 = vadd.f32 %v2218_v37, %v2193_v51 }
 0x327   :  { %v2690_v46 = vmul.f32 -1.442695, %v2224_v60  ;;  %v2691_v33 = vmul.f32 -1.442695, %v2225_v63  ;;  %v2692_v50 = vmul.f32 -1.442695, %v4042_v11 }
 0x329   :  { %2808 = vpow2.f32 %v2690_v46 }
 0x32a   :  { %2810 = vpow2.f32 %v2691_v33 }
 0x32b   :  { %2812 = vpow2.f32 %v2692_v50 }
 0x32f   :  { %v2809_v35 = vpop.eup %2808 }
 0x330   :  { %v2811_v5 = vpop.eup %2810  ;;  %v2240_v14 = vadd.f32 1.0, %v2809_v35 }
 0x331   :  { %v2813_v6 = vpop.eup %2812  ;;  %v2241_v38 = vadd.f32 1.0, %v2811_v5 }
 0x332   :  { %2814 = vrcp.f32 %v2240_v14  ;;  %v2242_v52 = vadd.f32 1.0, %v2813_v6  ;;  %v2267_v17 = vand.u32 2147483647, %v2240_v14  ;;  %v2269_v42 = vand.u32 2147483648, %v2240_v14 }
 0x333   :  { %2816 = vrcp.f32 %v2241_v38  ;;  %v2284_v10 = vand.u32 2147483648, %v2241_v38  ;;  %vm2263_vm7 = vweird.f32 %v2240_v14  ;;  %v2282_v30 = vand.u32 2147483647, %v2241_v38 }
 0x334   :  { %2818 = vrcp.f32 %v2242_v52  ;;  %vm2268_vm9 = vcmp.eq.f32.partialorder %v2267_v17, 8.507059e+37  ;;  %vm2278_vm0 = vweird.f32 %v2241_v38  ;;  %v2270_v13 = vor.u32 1.1754944e-38, %v2269_v42 }
 0x335   :  { %v2285_v44 = vor.u32 1.1754944e-38, %v2284_v10  ;;  %v2299_v9 = vand.u32 2147483648, %v2242_v52  ;;  %v2297_v40 = vand.u32 2147483647, %v2242_v52  ;;  %vm2283_vm13 = vcmp.eq.f32.partialorder %v2282_v30, 8.507059e+37 }
 0x336   :  { %vm2293_vm14 = vweird.f32 %v2242_v52 }
 0x337   :  { %v2300_v45 = vor.u32 1.1754944e-38, %v2299_v9  ;;  %vm2298_vm1 = vcmp.eq.f32.partialorder %v2297_v40, 8.507059e+37 }
 0x338   :  { %v2815_v4 = vpop.eup %2814 }
 0x339   :  { %v2817_v23 = vpop.eup %2816  ;;  %v2259_v34 = vmul.f32 %v2815_v4, %v2240_v14  ;;  %vm2264_vm6 = vweird.f32 %v2815_v4 }
 0x33a   :  { %v2274_v56 = vmul.f32 %v2817_v23, %v2241_v38  ;;  %v2819_v58 = vpop.eup %2818  ;;  %vm2279_vm8 = vweird.f32 %v2817_v23  ;;  %vm2265_vm10 = vmor %vm2263_vm7, %vm2264_vm6 }
 0x33b   :  { %v2260_v2 = vsub.f32 1.0, %v2259_v34  ;;  %v2289_v41 = vmul.f32 %v2819_v58, %v2242_v52  ;;  %vm2280_vm11 = vmor %vm2278_vm0, %vm2279_vm8  ;;  %vm2294_vm12 = vweird.f32 %v2819_v58 }
 0x33c   :  { %v2275_v16 = vsub.f32 1.0, %v2274_v56  ;;  %vm2295_vm15 = vmor %vm2293_vm14, %vm2294_vm12 }
 0x33d   :  { %v2261_v26 = vmul.f32 %v2815_v4, %v2260_v2  ;;  %v2290_v0 = vsub.f32 1.0, %v2289_v41 }
 0x33e   :  { %v2276_v59 = vmul.f32 %v2817_v23, %v2275_v16 }
 0x33f   :  { %v2262_v36 = vadd.f32 %v2815_v4, %v2261_v26  ;;  %v2291_v19 = vmul.f32 %v2819_v58, %v2290_v0 }
 0x340   :  { %v2277_v49 = vadd.f32 %v2817_v23, %v2276_v59 }
 0x341   :  { %v2266_v32 = vsel %vm2265_vm10, %v2815_v4, %v2262_v36  ;;  %v2292_v53 = vadd.f32 %v2819_v58, %v2291_v19 }
 0x342   :  { %v2271_v29 = vsel %vm2268_vm9, %v2270_v13, %v2266_v32  ;;  %v2281_v27 = vsel %vm2280_vm11, %v2817_v23, %v2277_v49 }
 0x343   :  { %v2304_v3 = vmul.f32 %v2271_v29, %v2224_v60  ;;  %v2286_v55 = vsel %vm2283_vm13, %v2285_v44, %v2281_v27  ;;  %v2296_v48 = vsel %vm2295_vm15, %v2819_v58, %v2292_v53 }
 0x344   :  { %v2305_v18 = vmul.f32 %v2286_v55, %v2225_v63  ;;  %v2301_v57 = vsel %vm2298_vm1, %v2300_v45, %v2296_v48 }
 0x345   :  { %2308 = vst [vmem:[#allocation6 + $0x8] sm:$0xff] %v2304_v3  ;;  %v2306_v62 = vmul.f32 %v2301_v57, %v4042_v11 }
 0x346   :  { %2309 = vst [vmem:[#allocation6 + $0x10] sm:$0xff] %v2305_v18 }
 0x347   :  { %2310 = vst [vmem:[#allocation6 + $0x18] sm:$0xff] %v2306_v62 }
 0x348   :  { %2321 = dma.vmem_to_hbm [thread:$0]  %s2317_s28, 512, %s2319_s30, [#allocation5]  }
 0x349   :  { %2870 = dma.done.wait [#allocation5], 512  }
 0x34a   :  { %2871 = vsyncadd [#allocation5], 4294966784 }
 0x34b   :  { %2326 = vsyncpa [#allocation4], 1 }
 0x34c   :  { %2327 = vsyncpa [#allocation5], 1 }

</bundles_post_ra>
